<compile_context>
chip_gen: v7x
topology: tpu7x:2x2x1
jax: 0.10.0
libtpu: 0.0.40
codegen_flags: <defaults>
</compile_context>

<pallas_src>
import functools

import jax
import jax.numpy as jnp
from jax.experimental import pallas as pl
from jax.experimental.pallas import tpu as pltpu


# ---------------------------------------------------------------------------
# Fully fused AE forward kernel: one grid step = one batch row-tile through
# all six (matmul + bias + activation) stages.
# ---------------------------------------------------------------------------
def _ae_fused_kernel(x_ref,
                     w1_ref, b1_ref, w2_ref, b2_ref, w3_ref, b3_ref,
                     w4_ref, b4_ref, w5_ref, b5_ref, w6_ref, b6_ref,
                     y_ref, z_ref, *, compute_dtype):
    def dense(h, w_ref, b_ref):
        # MXU matmul in compute_dtype (weights are already stored in
        # compute_dtype, and on the bf16 path the input x arrives in bf16, so
        # the layer-1 astype is a no-op).  f32 accumulation; bias / ReLU /
        # sigmoid stay on the f32 VPU/EUP path (v5e has no bf16 VPU).
        acc = jnp.dot(h.astype(compute_dtype), w_ref[...],
                      preferred_element_type=jnp.float32)
        return acc + b_ref[...]

    h = x_ref[...]

    # encoder
    h = jnp.maximum(dense(h, w1_ref, b1_ref), 0.0)
    h = jnp.maximum(dense(h, w2_ref, b2_ref), 0.0)
    z = dense(h, w3_ref, b3_ref)          # latent stays in vregs/VMEM

    # decoder
    h = jnp.maximum(dense(z, w4_ref, b4_ref), 0.0)
    h = jnp.maximum(dense(h, w5_ref, b5_ref), 0.0)
    y = jax.nn.sigmoid(dense(h, w6_ref, b6_ref))

    y_ref[...] = y.astype(y_ref.dtype)
    z_ref[...] = z.astype(z_ref.dtype)    # z written once, at the very end


def _round_up(x, m):
    return ((x + m - 1) // m) * m


def _default_compute_dtype():
    """bf16 on v6e / v7x (MXU + DMA win), f32 on v5e and older."""
    try:
        kind = jax.devices()[0].device_kind.lower()
    except Exception:  # pragma: no cover - e.g. no devices during tracing
        return jnp.float32
    if any(tag in kind for tag in ("v2", "v3", "v4", "v5")):
        return jnp.float32
    return jnp.bfloat16


def ae_forward(params, x, *, compute_dtype=None, tm=512):
    """x: (B, C, H, W) NCHW.  Returns (y, z): y (B, nin), z (B, nz)."""
    if compute_dtype is None:
        compute_dtype = _default_compute_dtype()
    compute_dtype = jnp.dtype(compute_dtype)

    B = x.shape[0]
    h = x.reshape(B, -1)                  # nn.Flatten (row-major == PyTorch NCHW)
    nin = h.shape[1]

    (w1, b1), (w2, b2), (w3, b3), (w4, b4), (w5, b5), (w6, b6) = params
    nh = w1.shape[1]
    nz = w3.shape[1]
    out_dtype = x.dtype

    # Row tile: big (default 512) to amortize the ~0.35 us/step overhead and
    # hit the HBM roofline; capped to the 8-aligned batch so tiny batches
    # don't allocate a huge tile.  grid = cdiv(B, tm): the partial trailing
    # tile is handled by Pallas with masked stores (rows are independent).
    tm_eff = max(8, min(tm, _round_up(B, 8)))
    grid_steps = pl.cdiv(B, tm_eff)

    # Cast weights (and, on the bf16 path, the activation stream x) at the
    # kernel boundary: this is what actually halves HBM->VMEM bytes on
    # v6e/v7x.  Biases stay f32 for the post-MXU VPU math.
    if compute_dtype != jnp.dtype(jnp.float32):
        h = h.astype(compute_dtype)
    cast_w = lambda w: w.astype(compute_dtype)
    flat_params = (cast_w(w1), b1, cast_w(w2), b2, cast_w(w3), b3,
                   cast_w(w4), b4, cast_w(w5), b5, cast_w(w6), b6)

    def full_spec(a):
        # Full-array VMEM-resident block, identical for every grid step
        # (constant index_map -> DMA'd once, not re-fetched per step).
        return pl.BlockSpec(a.shape, lambda i: (0, 0))

    # Advisory cost estimate so XLA schedules neighbours around this tiny call.
    layer_dims = [(w.shape[0], w.shape[1]) for (w, _) in params]
    flops = 2 * B * sum(di * do for di, do in layer_dims)
    transcendentals = B * nin  # final sigmoid
    bytes_accessed = (h.size * h.dtype.itemsize
                      + sum(p.size * p.dtype.itemsize for p in flat_params)
                      + B * nin * jnp.dtype(out_dtype).itemsize
                      + B * nz * jnp.dtype(out_dtype).itemsize)
    cost = pl.CostEstimate(flops=int(flops),
                           transcendentals=int(transcendentals),
                           bytes_accessed=int(bytes_accessed))

    # VMEM budget: double-buffered x/y tiles + resident weights (x2 for the
    # default pipeline buffering) + live activations.  Only raise the scoped
    # limit if we'd exceed the conservative 16 MiB default (v5e).
    # TODO(synk): if nin/nh grow (real 28x28 / nh=2048 config), consider bf16
    # weight storage or a K-grid axis over nin instead of fully resident W1/W6.
    w_bytes = sum(p.size * p.dtype.itemsize for p in flat_params)
    itm = h.dtype.itemsize
    vmem_est = (2 * tm_eff * nin * itm                     # input tiles
                + 2 * tm_eff * (nin + nz) * 4              # output tiles
                + 2 * w_bytes                              # resident params
                + 4 * tm_eff * max(nin, nh) * 4)           # live activations
    compiler_kwargs = dict(dimension_semantics=("parallel",))
    if vmem_est > 14 * 1024 * 1024:
        compiler_kwargs["vmem_limit_bytes"] = min(int(vmem_est * 1.25),
                                                  96 * 1024 * 1024)

    kernel = functools.partial(_ae_fused_kernel, compute_dtype=compute_dtype)
    y, z = pl.pallas_call(
        kernel,
        out_shape=(jax.ShapeDtypeStruct((B, nin), out_dtype),
                   jax.ShapeDtypeStruct((B, nz), out_dtype)),
        grid_spec=pltpu.PrefetchScalarGridSpec(
            num_scalar_prefetch=0,
            grid=(grid_steps,),
            in_specs=[pl.BlockSpec((tm_eff, nin), lambda i: (i, 0))]  # activations
                     + [full_spec(p) for p in flat_params],           # resident params
            out_specs=(pl.BlockSpec((tm_eff, nin), lambda i: (i, 0)),  # y (lane-dense)
                       pl.BlockSpec((tm_eff, nz), lambda i: (i, 0))),  # z (tiny)
        ),
        compiler_params=pltpu.CompilerParams(**compiler_kwargs),
        cost_estimate=cost,
    )(h, *flat_params)

    return y, z


# ---------------------------------------------------------------------------
# Parameters (deterministic synthetic init, PyTorch-Linear-like scale)
# ---------------------------------------------------------------------------
def init_ae_params(key, nz: int, nh: int, nin: int, dtype=jnp.float32):
    dims = [
        (nin, nh), (nh, nh), (nh, nz),   # encoder: L1, L2, L3
        (nz, nh), (nh, nh), (nh, nin),   # decoder: L4, L5, L6
    ]
    params = []
    for (din, dout) in dims:
        key, kw, kb = jax.random.split(key, 3)
        bound = 1.0 / jnp.sqrt(din)
        w = jax.random.uniform(kw, (din, dout), dtype, -bound, bound)
        b = jax.random.uniform(kb, (1, dout), dtype, -bound, bound)
        params.append((w, b))
    return params


# ---------------------------------------------------------------------------
# Pure-JAX reference of the same math (supports the same compute_dtype cast)
# ---------------------------------------------------------------------------
def ref_forward(params, x, compute_dtype=jnp.float32):
    h = x.reshape(x.shape[0], -1)

    def dense(h, w, b):
        return jnp.dot(h.astype(compute_dtype), w.astype(compute_dtype),
                       preferred_element_type=jnp.float32) + b

    (w1, b1), (w2, b2), (w3, b3), (w4, b4), (w5, b5), (w6, b6) = params
    h = jnp.maximum(dense(h, w1, b1), 0.0)
    h = jnp.maximum(dense(h, w2, b2), 0.0)
    zr = dense(h, w3, b3)
    h = jnp.maximum(dense(zr, w4, b4), 0.0)
    h = jnp.maximum(dense(h, w5, b5), 0.0)
    yr = jax.nn.sigmoid(dense(h, w6, b6))
    return yr, zr


if __name__ == "__main__":
    # Small shapes consistent with the module: imgsize=16 -> nin=16*16=256.
    # B=200 deliberately NOT a multiple of 8/128 to exercise the maskless-pad
    # partial-tile path.
    B, C, H, W = 200, 1, 16, 16
    nin = C * H * W          # 256
    nh = 128
    nz = 8

    key = jax.random.PRNGKey(0)
    kx, kp = jax.random.split(key)
    x = jax.random.normal(kx, (B, C, H, W), jnp.float32)
    params = init_ae_params(kp, nz=nz, nh=nh, nin=nin)

    # f32 path: same math as the PyTorch module (MXU default precision).
    fwd_f32 = jax.jit(functools.partial(ae_forward, compute_dtype=jnp.float32))
    y, z = fwd_f32(params, x)
    jax.block_until_ready((y, z))

    yr, zr = ref_forward(params, x)
    assert y.shape == (B, nin) and z.shape == (B, nz)
    assert jnp.allclose(y, yr, atol=1e-5, rtol=1e-5)
    assert jnp.allclose(z, zr, atol=1e-4, rtol=1e-4)

    # bf16-MXU perf path (v6e/v7x): check against an identically-cast reference.
    fwd_bf16 = jax.jit(functools.partial(ae_forward, compute_dtype=jnp.bfloat16))
    yb, zb = fwd_bf16(params, x)
    jax.block_until_ready((yb, zb))
    yrb, zrb = ref_forward(params, x, compute_dtype=jnp.bfloat16)
    assert jnp.allclose(yb, yrb, atol=1e-2, rtol=1e-2)
    assert jnp.allclose(zb, zrb, atol=1e-2, rtol=1e-2)

    # Auto per-generation default (bf16 on v6e/v7x, f32 on v5e and older).
    fwd_auto = jax.jit(ae_forward)
    ya, za = fwd_auto(params, x)
    jax.block_until_ready((ya, za))
    assert ya.shape == (B, nin) and za.shape == (B, nz)

    # Tiny-batch sanity (partial 8-row tile, grid of one step).
    xs = jax.random.normal(kx, (2, C, H, W), jnp.float32)
    ys, zs = fwd_f32(params, xs)
    jax.block_until_ready((ys, zs))
    ysr, zsr = ref_forward(params, xs)
    assert jnp.allclose(ys, ysr, atol=1e-5, rtol=1e-5)
    assert jnp.allclose(zs, zsr, atol=1e-4, rtol=1e-4)

    print("KERNEL_OK")
</pallas_src>

<mosaic_0001>
module attributes {stable_mosaic.version = 11 : i64} {
  func.func @_ae_fused_kernel(%arg0: i32, %arg1: memref<200x256xf32, #tpu.memory_space<vmem>>, %arg2: memref<256x128xf32, #tpu.memory_space<vmem>>, %arg3: memref<1x128xf32, #tpu.memory_space<vmem>>, %arg4: memref<128x128xf32, #tpu.memory_space<vmem>>, %arg5: memref<1x128xf32, #tpu.memory_space<vmem>>, %arg6: memref<128x8xf32, #tpu.memory_space<vmem>>, %arg7: memref<1x8xf32, #tpu.memory_space<vmem>>, %arg8: memref<8x128xf32, #tpu.memory_space<vmem>>, %arg9: memref<1x128xf32, #tpu.memory_space<vmem>>, %arg10: memref<128x128xf32, #tpu.memory_space<vmem>>, %arg11: memref<1x128xf32, #tpu.memory_space<vmem>>, %arg12: memref<128x256xf32, #tpu.memory_space<vmem>>, %arg13: memref<1x256xf32, #tpu.memory_space<vmem>>, %arg14: memref<200x256xf32, #tpu.memory_space<vmem>>, %arg15: memref<200x8xf32, #tpu.memory_space<vmem>>) attributes {dimension_semantics = [#tpu.dimension_semantics<parallel>], iteration_bounds = array<i64: 1>, scalar_prefetch = 0 : i64, scratch_operands = 0 : i64, tpu.core_type = #tpu.core_type<tc>, window_params = [{transform_indices = @transform_0, window_bounds = array<i64: 200, 256>}, {pipeline_mode = #tpu.pipeline_mode<synchronous>, transform_indices = @transform_1, window_bounds = array<i64: 256, 128>}, {pipeline_mode = #tpu.pipeline_mode<synchronous>, transform_indices = @transform_2, window_bounds = array<i64: 1, 128>}, {pipeline_mode = #tpu.pipeline_mode<synchronous>, transform_indices = @transform_3, window_bounds = array<i64: 128, 128>}, {pipeline_mode = #tpu.pipeline_mode<synchronous>, transform_indices = @transform_4, window_bounds = array<i64: 1, 128>}, {pipeline_mode = #tpu.pipeline_mode<synchronous>, transform_indices = @transform_5, window_bounds = array<i64: 128, 8>}, {pipeline_mode = #tpu.pipeline_mode<synchronous>, transform_indices = @transform_6, window_bounds = array<i64: 1, 8>}, {pipeline_mode = #tpu.pipeline_mode<synchronous>, transform_indices = @transform_7, window_bounds = array<i64: 8, 128>}, {pipeline_mode = #tpu.pipeline_mode<synchronous>, transform_indices = @transform_8, window_bounds = array<i64: 1, 128>}, {pipeline_mode = #tpu.pipeline_mode<synchronous>, transform_indices = @transform_9, window_bounds = array<i64: 128, 128>}, {pipeline_mode = #tpu.pipeline_mode<synchronous>, transform_indices = @transform_10, window_bounds = array<i64: 1, 128>}, {pipeline_mode = #tpu.pipeline_mode<synchronous>, transform_indices = @transform_11, window_bounds = array<i64: 128, 256>}, {pipeline_mode = #tpu.pipeline_mode<synchronous>, transform_indices = @transform_12, window_bounds = array<i64: 1, 256>}, {transform_indices = @transform_13, window_bounds = array<i64: 200, 256>}, {transform_indices = @transform_14, window_bounds = array<i64: 200, 8>}]} {
    %c0 = arith.constant 0 : index
    %c0_0 = arith.constant 0 : index
    %0 = vector.load %arg1[%c0, %c0_0] : memref<200x256xf32, #tpu.memory_space<vmem>>, vector<200x256xf32>
    %c0_1 = arith.constant 0 : index
    %c0_2 = arith.constant 0 : index
    %1 = vector.load %arg2[%c0_1, %c0_2] : memref<256x128xf32, #tpu.memory_space<vmem>>, vector<256x128xf32>
    %cst = arith.constant dense<0.000000e+00> : vector<200x128xf32>
    %2 = tpu.matmul %0, %1, %cst {dimension_numbers = #tpu.dot_dimension_numbers<[1], [0], [0], [1], [0, 0, 1, 1], [], []>} : vector<200x256xf32>, vector<256x128xf32>, vector<200x128xf32> -> vector<200x128xf32>
    %c0_3 = arith.constant 0 : index
    %c0_4 = arith.constant 0 : index
    %3 = vector.load %arg3[%c0_3, %c0_4] : memref<1x128xf32, #tpu.memory_space<vmem>>, vector<1x128xf32>
    %4 = vector.broadcast %3 : vector<1x128xf32> to vector<200x128xf32>
    %5 = arith.addf %2, %4 : vector<200x128xf32>
    %cst_5 = arith.constant 0.000000e+00 : f32
    %6 = vector.broadcast %cst_5 : f32 to vector<200x128xf32>
    %7 = arith.maximumf %5, %6 : vector<200x128xf32>
    %c0_6 = arith.constant 0 : index
    %c0_7 = arith.constant 0 : index
    %8 = vector.load %arg4[%c0_6, %c0_7] : memref<128x128xf32, #tpu.memory_space<vmem>>, vector<128x128xf32>
    %cst_8 = arith.constant dense<0.000000e+00> : vector<200x128xf32>
    %9 = tpu.matmul %7, %8, %cst_8 {dimension_numbers = #tpu.dot_dimension_numbers<[1], [0], [0], [1], [0, 0, 1, 1], [], []>} : vector<200x128xf32>, vector<128x128xf32>, vector<200x128xf32> -> vector<200x128xf32>
    %c0_9 = arith.constant 0 : index
    %c0_10 = arith.constant 0 : index
    %10 = vector.load %arg5[%c0_9, %c0_10] : memref<1x128xf32, #tpu.memory_space<vmem>>, vector<1x128xf32>
    %11 = vector.broadcast %10 : vector<1x128xf32> to vector<200x128xf32>
    %12 = arith.addf %9, %11 : vector<200x128xf32>
    %cst_11 = arith.constant 0.000000e+00 : f32
    %13 = vector.broadcast %cst_11 : f32 to vector<200x128xf32>
    %14 = arith.maximumf %12, %13 : vector<200x128xf32>
    %c0_12 = arith.constant 0 : index
    %c0_13 = arith.constant 0 : index
    %15 = vector.load %arg6[%c0_12, %c0_13] : memref<128x8xf32, #tpu.memory_space<vmem>>, vector<128x8xf32>
    %cst_14 = arith.constant dense<0.000000e+00> : vector<200x8xf32>
    %16 = tpu.matmul %14, %15, %cst_14 {dimension_numbers = #tpu.dot_dimension_numbers<[1], [0], [0], [1], [0, 0, 1, 1], [], []>} : vector<200x128xf32>, vector<128x8xf32>, vector<200x8xf32> -> vector<200x8xf32>
    %c0_15 = arith.constant 0 : index
    %c0_16 = arith.constant 0 : index
    %17 = vector.load %arg7[%c0_15, %c0_16] : memref<1x8xf32, #tpu.memory_space<vmem>>, vector<1x8xf32>
    %18 = vector.broadcast %17 : vector<1x8xf32> to vector<200x8xf32>
    %19 = arith.addf %16, %18 : vector<200x8xf32>
    %c0_17 = arith.constant 0 : index
    %c0_18 = arith.constant 0 : index
    %20 = vector.load %arg8[%c0_17, %c0_18] : memref<8x128xf32, #tpu.memory_space<vmem>>, vector<8x128xf32>
    %cst_19 = arith.constant dense<0.000000e+00> : vector<200x128xf32>
    %21 = tpu.matmul %19, %20, %cst_19 {dimension_numbers = #tpu.dot_dimension_numbers<[1], [0], [0], [1], [0, 0, 1, 1], [], []>} : vector<200x8xf32>, vector<8x128xf32>, vector<200x128xf32> -> vector<200x128xf32>
    %c0_20 = arith.constant 0 : index
    %c0_21 = arith.constant 0 : index
    %22 = vector.load %arg9[%c0_20, %c0_21] : memref<1x128xf32, #tpu.memory_space<vmem>>, vector<1x128xf32>
    %23 = vector.broadcast %22 : vector<1x128xf32> to vector<200x128xf32>
    %24 = arith.addf %21, %23 : vector<200x128xf32>
    %cst_22 = arith.constant 0.000000e+00 : f32
    %25 = vector.broadcast %cst_22 : f32 to vector<200x128xf32>
    %26 = arith.maximumf %24, %25 : vector<200x128xf32>
    %c0_23 = arith.constant 0 : index
    %c0_24 = arith.constant 0 : index
    %27 = vector.load %arg10[%c0_23, %c0_24] : memref<128x128xf32, #tpu.memory_space<vmem>>, vector<128x128xf32>
    %cst_25 = arith.constant dense<0.000000e+00> : vector<200x128xf32>
    %28 = tpu.matmul %26, %27, %cst_25 {dimension_numbers = #tpu.dot_dimension_numbers<[1], [0], [0], [1], [0, 0, 1, 1], [], []>} : vector<200x128xf32>, vector<128x128xf32>, vector<200x128xf32> -> vector<200x128xf32>
    %c0_26 = arith.constant 0 : index
    %c0_27 = arith.constant 0 : index
    %29 = vector.load %arg11[%c0_26, %c0_27] : memref<1x128xf32, #tpu.memory_space<vmem>>, vector<1x128xf32>
    %30 = vector.broadcast %29 : vector<1x128xf32> to vector<200x128xf32>
    %31 = arith.addf %28, %30 : vector<200x128xf32>
    %cst_28 = arith.constant 0.000000e+00 : f32
    %32 = vector.broadcast %cst_28 : f32 to vector<200x128xf32>
    %33 = arith.maximumf %31, %32 : vector<200x128xf32>
    %c0_29 = arith.constant 0 : index
    %c0_30 = arith.constant 0 : index
    %34 = vector.load %arg12[%c0_29, %c0_30] : memref<128x256xf32, #tpu.memory_space<vmem>>, vector<128x256xf32>
    %cst_31 = arith.constant dense<0.000000e+00> : vector<200x256xf32>
    %35 = tpu.matmul %33, %34, %cst_31 {dimension_numbers = #tpu.dot_dimension_numbers<[1], [0], [0], [1], [0, 0, 1, 1], [], []>} : vector<200x128xf32>, vector<128x256xf32>, vector<200x256xf32> -> vector<200x256xf32>
    %c0_32 = arith.constant 0 : index
    %c0_33 = arith.constant 0 : index
    %36 = vector.load %arg13[%c0_32, %c0_33] : memref<1x256xf32, #tpu.memory_space<vmem>>, vector<1x256xf32>
    %37 = vector.broadcast %36 : vector<1x256xf32> to vector<200x256xf32>
    %38 = arith.addf %35, %37 : vector<200x256xf32>
    %39 = arith.negf %38 : vector<200x256xf32>
    %40 = math.exp %39 : vector<200x256xf32>
    %cst_34 = arith.constant 1.000000e+00 : f32
    %41 = vector.broadcast %cst_34 : f32 to vector<200x256xf32>
    %42 = arith.addf %41, %40 : vector<200x256xf32>
    %43 = arith.divf %41, %42 : vector<200x256xf32>
    %c0_35 = arith.constant 0 : index
    %c0_36 = arith.constant 0 : index
    %44 = vector.load %arg14[%c0_35, %c0_36] : memref<200x256xf32, #tpu.memory_space<vmem>>, vector<200x256xf32>
    tpu.vector_store %arg14[%c0_35, %c0_36], %43 {strides = array<i32>} : memref<200x256xf32, #tpu.memory_space<vmem>>, vector<200x256xf32>,
    %c0_37 = arith.constant 0 : index
    %c0_38 = arith.constant 0 : index
    %45 = vector.load %arg15[%c0_37, %c0_38] : memref<200x8xf32, #tpu.memory_space<vmem>>, vector<200x8xf32>
    tpu.vector_store %arg15[%c0_37, %c0_38], %19 {strides = array<i32>} : memref<200x8xf32, #tpu.memory_space<vmem>>, vector<200x8xf32>,
    return
  }
  func.func @transform_0(%arg0: i32) -> (i32, i32) {
    %c0_i32 = arith.constant 0 : i32
    %c0_i32_0 = arith.constant 0 : i32
    return %arg0, %c0_i32 : i32, i32
  }
  func.func @transform_1(%arg0: i32) -> (i32, i32) {
    %c0_i32 = arith.constant 0 : i32
    %c0_i32_0 = arith.constant 0 : i32
    %c0_i32_1 = arith.constant 0 : i32
    return %c0_i32, %c0_i32_0 : i32, i32
  }
  func.func @transform_2(%arg0: i32) -> (i32, i32) {
    %c0_i32 = arith.constant 0 : i32
    %c0_i32_0 = arith.constant 0 : i32
    %c0_i32_1 = arith.constant 0 : i32
    return %c0_i32, %c0_i32_0 : i32, i32
  }
  func.func @transform_3(%arg0: i32) -> (i32, i32) {
    %c0_i32 = arith.constant 0 : i32
    %c0_i32_0 = arith.constant 0 : i32
    %c0_i32_1 = arith.constant 0 : i32
    return %c0_i32, %c0_i32_0 : i32, i32
  }
  func.func @transform_4(%arg0: i32) -> (i32, i32) {
    %c0_i32 = arith.constant 0 : i32
    %c0_i32_0 = arith.constant 0 : i32
    %c0_i32_1 = arith.constant 0 : i32
    return %c0_i32, %c0_i32_0 : i32, i32
  }
  func.func @transform_5(%arg0: i32) -> (i32, i32) {
    %c0_i32 = arith.constant 0 : i32
    %c0_i32_0 = arith.constant 0 : i32
    %c0_i32_1 = arith.constant 0 : i32
    return %c0_i32, %c0_i32_0 : i32, i32
  }
  func.func @transform_6(%arg0: i32) -> (i32, i32) {
    %c0_i32 = arith.constant 0 : i32
    %c0_i32_0 = arith.constant 0 : i32
    %c0_i32_1 = arith.constant 0 : i32
    return %c0_i32, %c0_i32_0 : i32, i32
  }
  func.func @transform_7(%arg0: i32) -> (i32, i32) {
    %c0_i32 = arith.constant 0 : i32
    %c0_i32_0 = arith.constant 0 : i32
    %c0_i32_1 = arith.constant 0 : i32
    return %c0_i32, %c0_i32_0 : i32, i32
  }
  func.func @transform_8(%arg0: i32) -> (i32, i32) {
    %c0_i32 = arith.constant 0 : i32
    %c0_i32_0 = arith.constant 0 : i32
    %c0_i32_1 = arith.constant 0 : i32
    return %c0_i32, %c0_i32_0 : i32, i32
  }
  func.func @transform_9(%arg0: i32) -> (i32, i32) {
    %c0_i32 = arith.constant 0 : i32
    %c0_i32_0 = arith.constant 0 : i32
    %c0_i32_1 = arith.constant 0 : i32
    return %c0_i32, %c0_i32_0 : i32, i32
  }
  func.func @transform_10(%arg0: i32) -> (i32, i32) {
    %c0_i32 = arith.constant 0 : i32
    %c0_i32_0 = arith.constant 0 : i32
    %c0_i32_1 = arith.constant 0 : i32
    return %c0_i32, %c0_i32_0 : i32, i32
  }
  func.func @transform_11(%arg0: i32) -> (i32, i32) {
    %c0_i32 = arith.constant 0 : i32
    %c0_i32_0 = arith.constant 0 : i32
    %c0_i32_1 = arith.constant 0 : i32
    return %c0_i32, %c0_i32_0 : i32, i32
  }
  func.func @transform_12(%arg0: i32) -> (i32, i32) {
    %c0_i32 = arith.constant 0 : i32
    %c0_i32_0 = arith.constant 0 : i32
    %c0_i32_1 = arith.constant 0 : i32
    return %c0_i32, %c0_i32_0 : i32, i32
  }
  func.func @transform_13(%arg0: i32) -> (i32, i32) {
    %c0_i32 = arith.constant 0 : i32
    %c0_i32_0 = arith.constant 0 : i32
    return %arg0, %c0_i32 : i32, i32
  }
  func.func @transform_14(%arg0: i32) -> (i32, i32) {
    %c0_i32 = arith.constant 0 : i32
    %c0_i32_0 = arith.constant 0 : i32
    return %arg0, %c0_i32 : i32, i32
  }
}

</mosaic_0001>

<bundles_post_ra>
// kernel: ae_forward.1
= control target key start
LH: loop header
LB: loop body
LE: loop exit
PB: predicated region body
PF: predicated region fallthrough
CT: control target
= control target key end

     0   :  { %v3018_v3 = vmov 0.0|0.0   ;;  %s4198_s0 = inlined_call_operand.vmem [shape: f32[200,256], index: 0, kind: input, shape index: {}]   ;;  %s4199_s1 = inlined_call_operand.vmem [shape: f32[256,128], index: 1, kind: input, shape index: {}]   ;;  %s4200_s2 = inlined_call_operand.vmem [shape: f32[1,128], index: 2, kind: input, shape index: {}]   ;;  %s4201_s3 = inlined_call_operand.vmem [shape: f32[128,128], index: 3, kind: input, shape index: {}]   ;;  %s4202_s4 = inlined_call_operand.vmem [shape: f32[1,128], index: 4, kind: input, shape index: {}]   ;;  %s4203_s5 = inlined_call_operand.vmem [shape: f32[128,8], index: 5, kind: input, shape index: {}]   ;;  %s4204_s6 = inlined_call_operand.vmem [shape: f32[1,8], index: 6, kind: input, shape index: {}]   ;;  %s4205_s7 = inlined_call_operand.vmem [shape: f32[8,128], index: 7, kind: input, shape index: {}]   ;;  %s4206_s8 = inlined_call_operand.vmem [shape: f32[1,128], index: 8, kind: input, shape index: {}]   ;;  %s4207_s9 = inlined_call_operand.vmem [shape: f32[128,128], index: 9, kind: input, shape index: {}]   ;;  %s4208_s10 = inlined_call_operand.vmem [shape: f32[1,128], index: 10, kind: input, shape index: {}]   ;;  %s4209_s11 = inlined_call_operand.vmem [shape: f32[128,256], index: 11, kind: input, shape index: {}]   ;;  %s4210_s12 = inlined_call_operand.vmem [shape: f32[1,256], index: 12, kind: input, shape index: {}]   ;;  %s4211_s13 = inlined_call_operand.hbm [shape: f32[200,256], index: 13, kind: output, shape index: {0}]   ;;  %s4212_s14 = inlined_call_operand.vmem [shape: f32[200,8], index: 14, kind: output, shape index: {1}]  }
   0x1   :  { %v97_v0 = vld [vmem:[%s4199_s1] sm:$0xff]  ;;  %v98_v1 = vld [vmem:[%s4199_s1 + $0x8] sm:$0xff]  ;;  %v99_v2 = vld [vmem:[%s4199_s1 + $0x10] sm:$0xff]  ;;  %2620 = vmatprep.subr.bf16.mxu0 %v3018_v3  ;;  %2668 = vmatprep.subr.bf16.mxu1 %v3018_v3 }
   0x2   :  { %v2621_v4 = vpack.c.bf16 %v98_v1, %v97_v0  ;;  %v100_v5 = vld [vmem:[%s4199_s1 + $0x18] sm:$0xff]  ;;  %v101_v7 = vld [vmem:[%s4199_s1 + $0x20] sm:$0xff]  ;;  %v102_v8 = vld [vmem:[%s4199_s1 + $0x28] sm:$0xff] }
   0x3   :  { %v2624_v6 = vpack.c.bf16 %v100_v5, %v99_v2  ;;  %v2627_v9 = vpack.c.bf16 %v102_v8, %v101_v7  ;;  %v103_v10 = vld [vmem:[%s4199_s1 + $0x30] sm:$0xff]  ;;  %v104_v11 = vld [vmem:[%s4199_s1 + $0x38] sm:$0xff]  ;;  %v48_v12 = vld [vmem:[%s4198_s0 + $0x8] sm:$0xff] }
   0x4   :  { %2622 = vmatpush1.bf16.msra.mxu0 %v2621_v4  ;;  %v2630_v13 = vpack.c.bf16 %v104_v11, %v103_v10  ;;  %200 = vmatprep.mubr.f32.mxu0 %v48_v12  ;;  %v105_v14 = vld [vmem:[%s4199_s1 + $0x40] sm:$0xff]  ;;  %v106_v15 = vld [vmem:[%s4199_s1 + $0x48] sm:$0xff]  ;;  %v107_v17 = vld [vmem:[%s4199_s1 + $0x50] sm:$0xff] }
   0x5   :  { %2623 = vmatprep.subr.bf16.mxu0 %v3018_v3  ;;  %v2633_v16 = vpack.c.bf16 %v106_v15, %v105_v14  ;;  %v108_v18 = vld [vmem:[%s4199_s1 + $0x58] sm:$0xff]  ;;  %v109_v20 = vld [vmem:[%s4199_s1 + $0x60] sm:$0xff]  ;;  %v110_v21 = vld [vmem:[%s4199_s1 + $0x68] sm:$0xff] }
   0x6   :  { %v2636_v19 = vpack.c.bf16 %v108_v18, %v107_v17  ;;  %v2639_v22 = vpack.c.bf16 %v110_v21, %v109_v20  ;;  %v111_v23 = vld [vmem:[%s4199_s1 + $0x70] sm:$0xff]  ;;  %v112_v24 = vld [vmem:[%s4199_s1 + $0x78] sm:$0xff] }
   0x8   :  { %2625 = vmatpush1.bf16.msra.mxu0 %v2624_v6 }
   0x9   :  { %2626 = vmatprep.subr.bf16.mxu0 %v3018_v3 }
   0xc   :  { %2628 = vmatpush1.bf16.msra.mxu0 %v2627_v9 }
   0xd   :  { %2629 = vmatprep.subr.bf16.mxu0 %v3018_v3 }
  0x10   :  { %2631 = vmatpush1.bf16.msra.mxu0 %v2630_v13 }
  0x11   :  { %2632 = vmatprep.subr.bf16.mxu0 %v3018_v3 }
  0x14   :  { %2634 = vmatpush1.bf16.msra.mxu0 %v2633_v16 }
  0x15   :  { %2635 = vmatprep.subr.bf16.mxu0 %v3018_v3 }
  0x18   :  { %2637 = vmatpush1.bf16.msra.mxu0 %v2636_v19 }
  0x19   :  { %2638 = vmatprep.subr.bf16.mxu0 %v3018_v3 }
  0x1a   :  { %20 = vsyncpa [#allocation3], 0  ;;  %v2642_v25 = vpack.c.bf16 %v112_v24, %v111_v23  ;;  %v113_v26 = vld [vmem:[%s4199_s1 + $0x80] sm:$0xff]  ;;  %v114_v27 = vld [vmem:[%s4199_s1 + $0x88] sm:$0xff]  ;;  %vm3019_vm0 = vmmov 0   ;;  %vm810_vm1 = vcmask 64512  }
  0x1b   :  { %v2645_v28 = vpack.c.bf16 %v114_v27, %v113_v26  ;;  %v115_v29 = vld [vmem:[%s4199_s1 + $0x90] sm:$0xff]  ;;  %v116_v30 = vld [vmem:[%s4199_s1 + $0x98] sm:$0xff]  ;;  %v351_v31 = vld [vmem:[%s4201_s3] sm:$0xff] }
  0x1c   :  { %2640 = vmatpush1.bf16.msra.mxu0 %v2639_v22  ;;  %v352_v32 = vld [vmem:[%s4201_s3 + $0x8] sm:$0xff]  ;;  %v353_v33 = vld [vmem:[%s4201_s3 + $0x10] sm:$0xff]  ;;  %v2648_v34 = vpack.c.bf16 %v116_v30, %v115_v29  ;;  %v354_v36 = vld [vmem:[%s4201_s3 + $0x18] sm:$0xff] }
  0x1d   :  { %2641 = vmatprep.subr.bf16.mxu0 %v3018_v3  ;;  %v2669_v35 = vpack.c.bf16 %v352_v32, %v351_v31  ;;  %v117_v37 = vld [vmem:[%s4199_s1 + $0xa0] sm:$0xff]  ;;  %v118_v38 = vld [vmem:[%s4199_s1 + $0xa8] sm:$0xff]  ;;  %v2672_v39 = vpack.c.bf16 %v354_v36, %v353_v33  ;;  %v119_v43 = vld [vmem:[%s4199_s1 + $0xb0] sm:$0xff] }
  0x1e   :  { %v355_v40 = vld [vmem:[%s4201_s3 + $0x20] sm:$0xff]  ;;  %v356_v41 = vld [vmem:[%s4201_s3 + $0x28] sm:$0xff]  ;;  %v2651_v42 = vpack.c.bf16 %v118_v38, %v117_v37  ;;  %v120_v44 = vld [vmem:[%s4199_s1 + $0xb8] sm:$0xff] }
  0x1f   :  { %2670 = vmatpush3.bf16.msra.mxu1 %v2669_v35  ;;  %v2675_v45 = vpack.c.bf16 %v356_v41, %v355_v40  ;;  %v357_v46 = vld [vmem:[%s4201_s3 + $0x30] sm:$0xff]  ;;  %v358_v47 = vld [vmem:[%s4201_s3 + $0x38] sm:$0xff]  ;;  %v2654_v48 = vpack.c.bf16 %v120_v44, %v119_v43  ;;  %v121_v49 = vld [vmem:[%s4199_s1 + $0xc0] sm:$0xff] }
  0x20   :  { %2643 = vmatpush1.bf16.msra.mxu0 %v2642_v25  ;;  %2671 = vmatprep.subr.bf16.mxu1 %v3018_v3  ;;  %v122_v50 = vld [vmem:[%s4199_s1 + $0xc8] sm:$0xff]  ;;  %v2678_v51 = vpack.c.bf16 %v358_v47, %v357_v46  ;;  %v359_v52 = vld [vmem:[%s4201_s3 + $0x40] sm:$0xff]  ;;  %v123_v55 = vld [vmem:[%s4199_s1 + $0xd0] sm:$0xff] }
  0x21   :  { %2644 = vmatprep.subr.bf16.mxu0 %v3018_v3  ;;  %v360_v53 = vld [vmem:[%s4201_s3 + $0x48] sm:$0xff]  ;;  %v2657_v54 = vpack.c.bf16 %v122_v50, %v121_v49  ;;  %v124_v56 = vld [vmem:[%s4199_s1 + $0xd8] sm:$0xff]  ;;  %v361_v58 = vld [vmem:[%s4201_s3 + $0x50] sm:$0xff] }
  0x22   :  { %v2681_v57 = vpack.c.bf16 %v360_v53, %v359_v52  ;;  %v362_v59 = vld [vmem:[%s4201_s3 + $0x58] sm:$0xff]  ;;  %v2660_v60 = vpack.c.bf16 %v124_v56, %v123_v55  ;;  %v125_v61 = vld [vmem:[%s4199_s1 + $0xe0] sm:$0xff]  ;;  %v126_v62 = vld [vmem:[%s4199_s1 + $0xe8] sm:$0xff] }
  0x23   :  { %2673 = vmatpush3.bf16.msra.mxu1 %v2672_v39  ;;  %v2684_v63 = vpack.c.bf16 %v362_v59, %v361_v58  ;;  %v363_v0 = vld [vmem:[%s4201_s3 + $0x60] sm:$0xff]  ;;  %v364_v1 = vld [vmem:[%s4201_s3 + $0x68] sm:$0xff]  ;;  %v2663_v2 = vpack.c.bf16 %v126_v62, %v125_v61  ;;  %v127_v4 = vld [vmem:[%s4199_s1 + $0xf0] sm:$0xff] }
  0x24   :  { %2646 = vmatpush1.bf16.msra.mxu0 %v2645_v28  ;;  %2674 = vmatprep.subr.bf16.mxu1 %v3018_v3  ;;  %v128_v5 = vld [vmem:[%s4199_s1 + $0xf8] sm:$0xff]  ;;  %v2687_v6 = vpack.c.bf16 %v364_v1, %v363_v0  ;;  %v47_v8 = vld [vmem:[%s4198_s0] sm:$0xff]  ;;  %v49_v10 = vld [vmem:[%s4198_s0 + $0x10] sm:$0xff] }
  0x25   :  { %2647 = vmatprep.subr.bf16.mxu0 %v3018_v3  ;;  %v2666_v7 = vpack.c.bf16 %v128_v5, %v127_v4  ;;  %v50_v9 = vld [vmem:[%s4198_s0 + $0x18] sm:$0xff]  ;;  %v52_v11 = vld [vmem:[%s4198_s0 + $0x28] sm:$0xff]  ;;  %v51_v12 = vld [vmem:[%s4198_s0 + $0x20] sm:$0xff] }
  0x26   :  { %v54_v13 = vld [vmem:[%s4198_s0 + $0x38] sm:$0xff]  ;;  %v53_v14 = vld [vmem:[%s4198_s0 + $0x30] sm:$0xff]  ;;  %v56_v15 = vld [vmem:[%s4198_s0 + $0x48] sm:$0xff] }
  0x27   :  { %2676 = vmatpush3.bf16.msra.mxu1 %v2675_v45  ;;  %v55_v16 = vld [vmem:[%s4198_s0 + $0x40] sm:$0xff]  ;;  %v58_v17 = vld [vmem:[%s4198_s0 + $0x58] sm:$0xff]  ;;  %v57_v18 = vld [vmem:[%s4198_s0 + $0x50] sm:$0xff] }
  0x28   :  { %2649 = vmatpush1.bf16.msra.mxu0 %v2648_v34  ;;  %2677 = vmatprep.subr.bf16.mxu1 %v3018_v3  ;;  %v60_v19 = vld [vmem:[%s4198_s0 + $0x68] sm:$0xff]  ;;  %v59_v20 = vld [vmem:[%s4198_s0 + $0x60] sm:$0xff]  ;;  %v62_v21 = vld [vmem:[%s4198_s0 + $0x78] sm:$0xff] }
  0x29   :  { %2650 = vmatprep.subr.bf16.mxu0 %v3018_v3  ;;  %v61_v22 = vld [vmem:[%s4198_s0 + $0x70] sm:$0xff]  ;;  %v64_v23 = vld [vmem:[%s4198_s0 + $0x88] sm:$0xff]  ;;  %v63_v24 = vld [vmem:[%s4198_s0 + $0x80] sm:$0xff] }
  0x2a   :  { %v66_v25 = vld [vmem:[%s4198_s0 + $0x98] sm:$0xff]  ;;  %v65_v26 = vld [vmem:[%s4198_s0 + $0x90] sm:$0xff]  ;;  %v68_v27 = vld [vmem:[%s4198_s0 + $0xa8] sm:$0xff] }
  0x2b   :  { %2679 = vmatpush3.bf16.msra.mxu1 %v2678_v51  ;;  %v67_v28 = vld [vmem:[%s4198_s0 + $0xa0] sm:$0xff]  ;;  %v70_v29 = vld [vmem:[%s4198_s0 + $0xb8] sm:$0xff]  ;;  %v69_v30 = vld [vmem:[%s4198_s0 + $0xb0] sm:$0xff] }
  0x2c   :  { %2652 = vmatpush1.bf16.msra.mxu0 %v2651_v42  ;;  %2680 = vmatprep.subr.bf16.mxu1 %v3018_v3  ;;  %v72_v31 = vld [vmem:[%s4198_s0 + $0xc8] sm:$0xff]  ;;  %v71_v32 = vld [vmem:[%s4198_s0 + $0xc0] sm:$0xff]  ;;  %v74_v33 = vld [vmem:[%s4198_s0 + $0xd8] sm:$0xff] }
  0x2d   :  { %2653 = vmatprep.subr.bf16.mxu0 %v3018_v3  ;;  %v73_v34 = vld [vmem:[%s4198_s0 + $0xd0] sm:$0xff]  ;;  %v76_v35 = vld [vmem:[%s4198_s0 + $0xe8] sm:$0xff]  ;;  %v75_v36 = vld [vmem:[%s4198_s0 + $0xe0] sm:$0xff] }
  0x2e   :  { %v78_v37 = vld [vmem:[%s4198_s0 + $0xf8] sm:$0xff]  ;;  %v77_v38 = vld [vmem:[%s4198_s0 + $0xf0] sm:$0xff]  ;;  %v80_v39 = vld [vmem:[%s4198_s0 + $0x108] sm:$0xff] }
  0x2f   :  { %2682 = vmatpush3.bf16.msra.mxu1 %v2681_v57  ;;  %v79_v40 = vld [vmem:[%s4198_s0 + $0x100] sm:$0xff]  ;;  %v82_v41 = vld [vmem:[%s4198_s0 + $0x118] sm:$0xff]  ;;  %v81_v42 = vld [vmem:[%s4198_s0 + $0x110] sm:$0xff]  ;;  %v3020_v57 = vmov 0.0  }
  0x30   :  { %2655 = vmatpush1.bf16.msra.mxu0 %v2654_v48  ;;  %2683 = vmatprep.subr.bf16.mxu1 %v3018_v3  ;;  %v84_v43 = vld [vmem:[%s4198_s0 + $0x128] sm:$0xff]  ;;  %v83_v44 = vld [vmem:[%s4198_s0 + $0x120] sm:$0xff]  ;;  %v86_v45 = vld [vmem:[%s4198_s0 + $0x138] sm:$0xff] }
  0x31   :  { %2656 = vmatprep.subr.bf16.mxu0 %v3018_v3  ;;  %v85_v46 = vld [vmem:[%s4198_s0 + $0x130] sm:$0xff]  ;;  %v88_v47 = vld [vmem:[%s4198_s0 + $0x148] sm:$0xff]  ;;  %v87_v48 = vld [vmem:[%s4198_s0 + $0x140] sm:$0xff]  ;;  %2254 = vmatprep.mubr.msk.f32.mxu1 %vm3019_vm0, %v3020_v57 }
  0x32   :  { %v90_v49 = vld [vmem:[%s4198_s0 + $0x158] sm:$0xff]  ;;  %v89_v50 = vld [vmem:[%s4198_s0 + $0x150] sm:$0xff]  ;;  %v92_v51 = vld [vmem:[%s4198_s0 + $0x168] sm:$0xff] }
  0x33   :  { %2685 = vmatpush3.bf16.msra.mxu1 %v2684_v63  ;;  %v365_v52 = vld [vmem:[%s4201_s3 + $0x70] sm:$0xff]  ;;  %v366_v53 = vld [vmem:[%s4201_s3 + $0x78] sm:$0xff]  ;;  %v91_v55 = vld [vmem:[%s4198_s0 + $0x160] sm:$0xff] }
  0x34   :  { %2658 = vmatpush1.bf16.msra.mxu0 %v2657_v54  ;;  %2686 = vmatprep.subr.bf16.mxu1 %v3018_v3  ;;  %v2690_v54 = vpack.c.bf16 %v366_v53, %v365_v52  ;;  %v94_v56 = vld [vmem:[%s4198_s0 + $0x178] sm:$0xff]  ;;  %v93_v58 = vld [vmem:[%s4198_s0 + $0x170] sm:$0xff]  ;;  %v96_v59 = vld [vmem:[%s4198_s0 + $0x188] sm:$0xff] }
  0x35   :  { %2659 = vmatprep.subr.bf16.mxu0 %v3018_v3  ;;  %v3426_v61 = vld [vmem:[%s4200_s2] ss:$0 sm:$0xff]  ;;  %v590_v63 = vld [vmem:[%s4203_s5 + $0x8] sm:$0xff] }
  0x36   :  { %v589_v62 = vld [vmem:[%s4203_s5] sm:$0xff] }
  0x37   :  { %2688 = vmatpush3.bf16.msra.mxu1 %v2687_v6  ;;  %v2693_v4 = vpack.c.bf16 %v590_v63, %v589_v62  ;;  %v591_v6 = vld [vmem:[%s4203_s5 + $0x10] sm:$0xff] }
  0x38   :  { %2661 = vmatpush1.bf16.msra.mxu0 %v2660_v60  ;;  %2689 = vmatprep.subr.bf16.mxu1 %v3018_v3  ;;  %v95_v60 = vld [vmem:[%s4198_s0 + $0x180] sm:$0xff] }
  0x39   :  { %2662 = vmatprep.subr.bf16.mxu0 %v3018_v3 }
  0x3b   :  { %2691 = vmatpush3.bf16.msra.mxu1 %v2690_v54 }
  0x3c   :  { %2664 = vmatpush1.bf16.msra.mxu0 %v2663_v2  ;;  %2692 = vmatprep.subr.bf16.mxu1 %v3018_v3 }
  0x3d   :  { %2665 = vmatprep.subr.bf16.mxu0 %v3018_v3 }
  0x40   :  { %2667 = vmatpush1.bf16.msra.mxu0 %v2666_v7  ;;  %v592_v7 = vld [vmem:[%s4203_s5 + $0x18] sm:$0xff] }
  0x41   :  { %2436 = vmatprep.subr.mxu0 %v3020_v57 }
  0x43   :  { %201 = vmatmul.mubr.f32.vlgmr.msra.gmra.mrb[0].mxu0 %v47_v8 }
  0x44   :  { %205 = vmatprep.mubr.f32.mxu0 %v50_v9 }
  0x47   :  { %206 = vmatmul.mubr.f32.gmra.mrb[2].mxu0 %v49_v10 }
  0x48   :  { %210 = vmatprep.mubr.f32.mxu0 %v52_v11  ;;  %v2696_v11 = vpack.c.bf16 %v592_v7, %v591_v6 }
  0x4b   :  { %211 = vmatmul.mubr.f32.gmra.mrb[4].mxu0 %v51_v12 }
  0x4c   :  { %215 = vmatprep.mubr.f32.mxu0 %v54_v13  ;;  %v593_v13 = vld [vmem:[%s4203_s5 + $0x20] sm:$0xff] }
  0x4f   :  { %216 = vmatmul.mubr.f32.gmra.mrb[6].mxu0 %v53_v14  ;;  %v594_v14 = vld [vmem:[%s4203_s5 + $0x28] sm:$0xff] }
  0x50   :  { %220 = vmatprep.mubr.f32.mxu0 %v56_v15 }
  0x53   :  { %221 = vmatmul.mubr.f32.gmra.mrb[8].mxu0 %v55_v16 }
  0x54   :  { %225 = vmatprep.mubr.f32.mxu0 %v58_v17 }
  0x57   :  { %226 = vmatmul.mubr.f32.gmra.mrb[10].mxu0 %v57_v18  ;;  %v2699_v18 = vpack.c.bf16 %v594_v14, %v593_v13 }
  0x58   :  { %230 = vmatprep.mubr.f32.mxu0 %v60_v19 }
  0x5b   :  { %231 = vmatmul.mubr.f32.gmra.mrb[12].mxu0 %v59_v20  ;;  %v595_v20 = vld [vmem:[%s4203_s5 + $0x30] sm:$0xff] }
  0x5c   :  { %235 = vmatprep.mubr.f32.mxu0 %v62_v21  ;;  %v596_v21 = vld [vmem:[%s4203_s5 + $0x38] sm:$0xff] }
  0x5f   :  { %236 = vmatmul.mubr.f32.gmra.mrb[14].mxu0 %v61_v22 }
  0x60   :  { %240 = vmatprep.mubr.f32.mxu0 %v64_v23 }
  0x63   :  { %241 = vmatmul.mubr.f32.gmra.mrb[16].mxu0 %v63_v24 }
  0x64   :  { %245 = vmatprep.mubr.f32.mxu0 %v66_v25  ;;  %v2702_v25 = vpack.c.bf16 %v596_v21, %v595_v20 }
  0x67   :  { %246 = vmatmul.mubr.f32.gmra.mrb[18].mxu0 %v65_v26 }
  0x68   :  { %250 = vmatprep.mubr.f32.mxu0 %v68_v27  ;;  %v597_v27 = vld [vmem:[%s4203_s5 + $0x40] sm:$0xff] }
  0x6b   :  { %251 = vmatmul.mubr.f32.gmra.mrb[20].mxu0 %v67_v28  ;;  %v598_v28 = vld [vmem:[%s4203_s5 + $0x48] sm:$0xff] }
  0x6c   :  { %255 = vmatprep.mubr.f32.mxu0 %v70_v29 }
  0x6f   :  { %256 = vmatmul.mubr.f32.gmra.mrb[22].mxu0 %v69_v30 }
  0x70   :  { %260 = vmatprep.mubr.f32.mxu0 %v72_v31 }
  0x73   :  { %261 = vmatmul.mubr.f32.gmra.mrb[24].mxu0 %v71_v32  ;;  %v2705_v32 = vpack.c.bf16 %v598_v28, %v597_v27 }
  0x74   :  { %265 = vmatprep.mubr.f32.mxu0 %v74_v33 }
  0x77   :  { %266 = vmatmul.mubr.f32.gmra.mrb[26].mxu0 %v73_v34  ;;  %v599_v34 = vld [vmem:[%s4203_s5 + $0x50] sm:$0xff] }
  0x78   :  { %270 = vmatprep.mubr.f32.mxu0 %v76_v35  ;;  %v600_v35 = vld [vmem:[%s4203_s5 + $0x58] sm:$0xff] }
  0x7b   :  { %271 = vmatmul.mubr.f32.gmra.mrb[28].mxu0 %v75_v36 }
  0x7c   :  { %275 = vmatprep.mubr.f32.mxu0 %v78_v37 }
  0x7f   :  { %276 = vmatmul.mubr.f32.gmra.mrb[30].mxu0 %v77_v38 }
  0x80   :  { %280 = vmatprep.mubr.f32.mxu0 %v80_v39  ;;  %v2708_v39 = vpack.c.bf16 %v600_v35, %v599_v34 }
  0x83   :  { %281 = vmatmul.mubr.f32.gmra.mrb[32].mxu0 %v79_v40 }
  0x84   :  { %285 = vmatprep.mubr.f32.mxu0 %v82_v41  ;;  %v601_v41 = vld [vmem:[%s4203_s5 + $0x60] sm:$0xff] }
  0x87   :  { %286 = vmatmul.mubr.f32.gmra.mrb[34].mxu0 %v81_v42  ;;  %v602_v42 = vld [vmem:[%s4203_s5 + $0x68] sm:$0xff] }
  0x88   :  { %290 = vmatprep.mubr.f32.mxu0 %v84_v43 }
  0x8b   :  { %291 = vmatmul.mubr.f32.gmra.mrb[36].mxu0 %v83_v44 }
  0x8c   :  { %295 = vmatprep.mubr.f32.mxu0 %v86_v45 }
  0x8f   :  { %296 = vmatmul.mubr.f32.gmra.mrb[38].mxu0 %v85_v46  ;;  %v2711_v46 = vpack.c.bf16 %v602_v42, %v601_v41 }
  0x90   :  { %300 = vmatprep.mubr.f32.mxu0 %v88_v47 }
  0x93   :  { %301 = vmatmul.mubr.f32.gmra.mrb[40].mxu0 %v87_v48  ;;  %v603_v48 = vld [vmem:[%s4203_s5 + $0x70] sm:$0xff] }
  0x94   :  { %305 = vmatprep.mubr.f32.mxu0 %v90_v49  ;;  %v604_v49 = vld [vmem:[%s4203_s5 + $0x78] sm:$0xff] }
  0x95   :  { %v2714_v53 = vpack.c.bf16 %v604_v49, %v603_v48 }
  0x97   :  { %306 = vmatmul.mubr.f32.gmra.mrb[42].mxu0 %v89_v50 }
  0x98   :  { %310 = vmatprep.mubr.f32.mxu0 %v92_v51 }
  0x9b   :  { %311 = vmatmul.mubr.f32.gmra.mrb[44].mxu0 %v91_v55 }
  0x9c   :  { %315 = vmatprep.mubr.f32.mxu0 %v94_v56 }
  0x9f   :  { %316 = vmatmul.mubr.f32.gmra.mrb[46].mxu0 %v93_v58 }
  0xa0   :  { %320 = vmatprep.mubr.f32.mxu0 %v96_v59 }
  0xa3   :  { %321 = vmatmul.mubr.f32.gmra.mrb[48].mxu0 %v95_v60 }
  0xa4   :  { %2438 = vmatprep.mubr.msk.f32.mxu0 %vm3019_vm0, %v3020_v57 }
 0x116   :  { %v202_v0 = vpop.f32.mrb[0].mxu0 }
 0x117   :  { %v203_v1 = vadd.f32 %v3426_v61, %v202_v0  ;;  %v204_v2 = vpop.f32.mrb[1].mxu0 }
 0x119   :  { %v326_v5 = vmax.f32 %v203_v1, 0.0 }
 0x11a   :  { %v207_v8 = vpop.f32.mrb[2].mxu0 }
 0x11b   :  { %v208_v9 = vadd.f32 %v3426_v61, %v207_v8  ;;  %v209_v10 = vpop.f32.mrb[3].mxu0  ;;  %2255 = vmatmul.mubr.f32.vlgmr.msra.gmra.mrb[0].mxu1 %v326_v5 }
 0x11c   :  { %2257 = vmatprep.mubr.msk.f32.mxu1 %vm3019_vm0, %v3020_v57  ;;  %2694 = vmatpush3.bf16.msra.mxu1 %v2693_v4 }
 0x11d   :  { %v327_v12 = vmax.f32 %v208_v9, 0.0  ;;  %2695 = vmatprep.subr.bf16.mxu1 %v3018_v3 }
 0x11e   :  { %v212_v15 = vpop.f32.mrb[4].mxu0 }
 0x11f   :  { %v213_v16 = vadd.f32 %v3426_v61, %v212_v15  ;;  %v214_v17 = vpop.f32.mrb[5].mxu0  ;;  %2258 = vmatmul.mubr.f32.gmra.mrb[2].mxu1 %v327_v12 }
 0x120   :  { %2260 = vmatprep.mubr.msk.f32.mxu1 %vm3019_vm0, %v3020_v57  ;;  %2697 = vmatpush3.bf16.msra.mxu1 %v2696_v11 }
 0x121   :  { %v328_v19 = vmax.f32 %v213_v16, 0.0  ;;  %2698 = vmatprep.subr.bf16.mxu1 %v3018_v3 }
 0x122   :  { %v217_v22 = vpop.f32.mrb[6].mxu0 }
 0x123   :  { %v218_v23 = vadd.f32 %v3426_v61, %v217_v22  ;;  %v219_v24 = vpop.f32.mrb[7].mxu0  ;;  %2261 = vmatmul.mubr.f32.gmra.mrb[4].mxu1 %v328_v19 }
 0x124   :  { %2263 = vmatprep.mubr.msk.f32.mxu1 %vm3019_vm0, %v3020_v57  ;;  %2700 = vmatpush3.bf16.msra.mxu1 %v2699_v18 }
 0x125   :  { %v329_v26 = vmax.f32 %v218_v23, 0.0  ;;  %2701 = vmatprep.subr.bf16.mxu1 %v3018_v3 }
 0x126   :  { %v222_v29 = vpop.f32.mrb[8].mxu0 }
 0x127   :  { %v223_v30 = vadd.f32 %v3426_v61, %v222_v29  ;;  %v224_v31 = vpop.f32.mrb[9].mxu0  ;;  %2264 = vmatmul.mubr.f32.gmra.mrb[6].mxu1 %v329_v26 }
 0x128   :  { %2266 = vmatprep.mubr.msk.f32.mxu1 %vm3019_vm0, %v3020_v57  ;;  %2703 = vmatpush3.bf16.msra.mxu1 %v2702_v25 }
 0x129   :  { %v330_v33 = vmax.f32 %v223_v30, 0.0  ;;  %2704 = vmatprep.subr.bf16.mxu1 %v3018_v3 }
 0x12a   :  { %v227_v36 = vpop.f32.mrb[10].mxu0 }
 0x12b   :  { %v228_v37 = vadd.f32 %v3426_v61, %v227_v36  ;;  %v229_v38 = vpop.f32.mrb[11].mxu0  ;;  %2267 = vmatmul.mubr.f32.gmra.mrb[8].mxu1 %v330_v33 }
 0x12c   :  { %2269 = vmatprep.mubr.msk.f32.mxu1 %vm3019_vm0, %v3020_v57  ;;  %2706 = vmatpush3.bf16.msra.mxu1 %v2705_v32 }
 0x12d   :  { %v331_v40 = vmax.f32 %v228_v37, 0.0  ;;  %2707 = vmatprep.subr.bf16.mxu1 %v3018_v3 }
 0x12e   :  { %v232_v43 = vpop.f32.mrb[12].mxu0 }
 0x12f   :  { %v233_v44 = vadd.f32 %v3426_v61, %v232_v43  ;;  %v234_v45 = vpop.f32.mrb[13].mxu0  ;;  %2270 = vmatmul.mubr.f32.gmra.mrb[10].mxu1 %v331_v40 }
 0x130   :  { %2272 = vmatprep.mubr.msk.f32.mxu1 %vm3019_vm0, %v3020_v57  ;;  %2709 = vmatpush3.bf16.msra.mxu1 %v2708_v39 }
 0x131   :  { %v332_v47 = vmax.f32 %v233_v44, 0.0  ;;  %2710 = vmatprep.subr.bf16.mxu1 %v3018_v3 }
 0x132   :  { %v237_v50 = vpop.f32.mrb[14].mxu0 }
 0x133   :  { %v238_v51 = vadd.f32 %v3426_v61, %v237_v50  ;;  %v239_v52 = vpop.f32.mrb[15].mxu0  ;;  %2273 = vmatmul.mubr.f32.gmra.mrb[12].mxu1 %v332_v47 }
 0x134   :  { %2275 = vmatprep.mubr.msk.f32.mxu1 %vm3019_vm0, %v3020_v57  ;;  %2712 = vmatpush3.bf16.msra.mxu1 %v2711_v46 }
 0x135   :  { %v333_v54 = vmax.f32 %v238_v51, 0.0  ;;  %2713 = vmatprep.subr.bf16.mxu1 %v3018_v3 }
 0x136   :  { %v242_v55 = vpop.f32.mrb[16].mxu0 }
 0x137   :  { %v243_v56 = vadd.f32 %v3426_v61, %v242_v55  ;;  %v244_v58 = vpop.f32.mrb[17].mxu0  ;;  %2276 = vmatmul.mubr.f32.gmra.mrb[14].mxu1 %v333_v54 }
 0x138   :  { %2278 = vmatprep.mubr.msk.f32.mxu1 %vm3019_vm0, %v3020_v57  ;;  %2715 = vmatpush3.bf16.msra.mxu1 %v2714_v53 }
 0x139   :  { %v334_v59 = vmax.f32 %v243_v56, 0.0  ;;  %2716 = vmatprep.subr.bf16.mxu1 %v3018_v3 }
 0x13a   :  { %v247_v60 = vpop.f32.mrb[18].mxu0 }
 0x13b   :  { %v248_v62 = vadd.f32 %v3426_v61, %v247_v60  ;;  %v249_v63 = vpop.f32.mrb[19].mxu0  ;;  %2279 = vmatmul.mubr.f32.gmra.mrb[16].mxu1 %v334_v59 }
 0x13c   :  { %2281 = vmatprep.mubr.msk.f32.mxu1 %vm3019_vm0, %v3020_v57 }
 0x13d   :  { %v335_v0 = vmax.f32 %v248_v62, 0.0 }
 0x13e   :  { %v252_v1 = vpop.f32.mrb[20].mxu0 }
 0x13f   :  { %v253_v2 = vadd.f32 %v3426_v61, %v252_v1  ;;  %v254_v4 = vpop.f32.mrb[21].mxu0  ;;  %2282 = vmatmul.mubr.f32.gmra.mrb[18].mxu1 %v335_v0  ;;  %v802_v0 = vld [vmem:[%s4205_s7] sm:$0xff] }
 0x140   :  { %2284 = vmatprep.mubr.msk.f32.mxu1 %vm3019_vm0, %v3020_v57  ;;  %2437 = vmatpush3.msra.mxu0 %v802_v0  ;;  %v3565_v1 = vld [vmem:[%s4202_s4] ss:$0 sm:$0xff] }
 0x141   :  { %v336_v5 = vmax.f32 %v253_v2, 0.0 }
 0x142   :  { %v257_v6 = vpop.f32.mrb[22].mxu0 }
 0x143   :  { %v258_v7 = vadd.f32 %v3426_v61, %v257_v6  ;;  %v259_v8 = vpop.f32.mrb[23].mxu0  ;;  %2285 = vmatmul.mubr.f32.gmra.mrb[20].mxu1 %v336_v5 }
 0x144   :  { %2287 = vmatprep.mubr.msk.f32.mxu1 %vm3019_vm0, %v3020_v57 }
 0x145   :  { %v337_v9 = vmax.f32 %v258_v7, 0.0 }
 0x146   :  { %v262_v10 = vpop.f32.mrb[24].mxu0 }
 0x147   :  { %v263_v11 = vadd.f32 %v3426_v61, %v262_v10  ;;  %v264_v12 = vpop.f32.mrb[25].mxu0  ;;  %2288 = vmatmul.mubr.f32.gmra.mrb[22].mxu1 %v337_v9 }
 0x148   :  { %2290 = vmatprep.mubr.msk.f32.mxu1 %vm3019_vm0, %v3020_v57 }
 0x149   :  { %v338_v13 = vmax.f32 %v263_v11, 0.0 }
 0x14a   :  { %v267_v14 = vpop.f32.mrb[26].mxu0 }
 0x14b   :  { %v268_v15 = vadd.f32 %v3426_v61, %v267_v14  ;;  %v269_v16 = vpop.f32.mrb[27].mxu0  ;;  %2291 = vmatmul.mubr.f32.gmra.mrb[24].mxu1 %v338_v13 }
 0x14c   :  { %2293 = vmatprep.mubr.msk.f32.mxu1 %vm3019_vm0, %v3020_v57 }
 0x14d   :  { %v339_v17 = vmax.f32 %v268_v15, 0.0 }
 0x14e   :  { %v272_v18 = vpop.f32.mrb[28].mxu0 }
 0x14f   :  { %v273_v19 = vadd.f32 %v3426_v61, %v272_v18  ;;  %v274_v20 = vpop.f32.mrb[29].mxu0  ;;  %2294 = vmatmul.mubr.f32.gmra.mrb[26].mxu1 %v339_v17 }
 0x150   :  { %2296 = vmatprep.mubr.msk.f32.mxu1 %vm3019_vm0, %v3020_v57 }
 0x151   :  { %v340_v21 = vmax.f32 %v273_v19, 0.0 }
 0x152   :  { %v277_v22 = vpop.f32.mrb[30].mxu0 }
 0x153   :  { %v278_v23 = vadd.f32 %v3426_v61, %v277_v22  ;;  %v279_v24 = vpop.f32.mrb[31].mxu0  ;;  %2297 = vmatmul.mubr.f32.gmra.mrb[28].mxu1 %v340_v21 }
 0x154   :  { %2299 = vmatprep.mubr.msk.f32.mxu1 %vm3019_vm0, %v3020_v57 }
 0x155   :  { %v341_v25 = vmax.f32 %v278_v23, 0.0 }
 0x156   :  { %v282_v26 = vpop.f32.mrb[32].mxu0 }
 0x157   :  { %v283_v27 = vadd.f32 %v3426_v61, %v282_v26  ;;  %v284_v28 = vpop.f32.mrb[33].mxu0  ;;  %2300 = vmatmul.mubr.f32.gmra.mrb[30].mxu1 %v341_v25 }
 0x158   :  { %2302 = vmatprep.mubr.msk.f32.mxu1 %vm3019_vm0, %v3020_v57 }
 0x159   :  { %v342_v29 = vmax.f32 %v283_v27, 0.0 }
 0x15a   :  { %v287_v30 = vpop.f32.mrb[34].mxu0 }
 0x15b   :  { %v288_v31 = vadd.f32 %v3426_v61, %v287_v30  ;;  %v289_v32 = vpop.f32.mrb[35].mxu0  ;;  %2303 = vmatmul.mubr.f32.gmra.mrb[32].mxu1 %v342_v29 }
 0x15c   :  { %2305 = vmatprep.mubr.msk.f32.mxu1 %vm3019_vm0, %v3020_v57 }
 0x15d   :  { %v343_v33 = vmax.f32 %v288_v31, 0.0 }
 0x15e   :  { %v292_v34 = vpop.f32.mrb[36].mxu0 }
 0x15f   :  { %v293_v35 = vadd.f32 %v3426_v61, %v292_v34  ;;  %v294_v36 = vpop.f32.mrb[37].mxu0  ;;  %2306 = vmatmul.mubr.f32.gmra.mrb[34].mxu1 %v343_v33 }
 0x160   :  { %2308 = vmatprep.mubr.msk.f32.mxu1 %vm3019_vm0, %v3020_v57 }
 0x161   :  { %v344_v37 = vmax.f32 %v293_v35, 0.0 }
 0x162   :  { %v297_v38 = vpop.f32.mrb[38].mxu0 }
 0x163   :  { %v298_v39 = vadd.f32 %v3426_v61, %v297_v38  ;;  %v299_v40 = vpop.f32.mrb[39].mxu0  ;;  %2309 = vmatmul.mubr.f32.gmra.mrb[36].mxu1 %v344_v37 }
 0x164   :  { %2311 = vmatprep.mubr.msk.f32.mxu1 %vm3019_vm0, %v3020_v57 }
 0x165   :  { %v345_v41 = vmax.f32 %v298_v39, 0.0 }
 0x166   :  { %v302_v42 = vpop.f32.mrb[40].mxu0 }
 0x167   :  { %v303_v43 = vadd.f32 %v3426_v61, %v302_v42  ;;  %v304_v44 = vpop.f32.mrb[41].mxu0  ;;  %2312 = vmatmul.mubr.f32.gmra.mrb[38].mxu1 %v345_v41 }
 0x168   :  { %2314 = vmatprep.mubr.msk.f32.mxu1 %vm3019_vm0, %v3020_v57 }
 0x169   :  { %v346_v45 = vmax.f32 %v303_v43, 0.0 }
 0x16a   :  { %v307_v46 = vpop.f32.mrb[42].mxu0 }
 0x16b   :  { %v308_v47 = vadd.f32 %v3426_v61, %v307_v46  ;;  %v309_v48 = vpop.f32.mrb[43].mxu0  ;;  %2315 = vmatmul.mubr.f32.gmra.mrb[40].mxu1 %v346_v45 }
 0x16c   :  { %2317 = vmatprep.mubr.msk.f32.mxu1 %vm3019_vm0, %v3020_v57 }
 0x16d   :  { %v347_v49 = vmax.f32 %v308_v47, 0.0 }
 0x16e   :  { %v312_v50 = vpop.f32.mrb[44].mxu0 }
 0x16f   :  { %v313_v51 = vadd.f32 %v3426_v61, %v312_v50  ;;  %v314_v52 = vpop.f32.mrb[45].mxu0  ;;  %2318 = vmatmul.mubr.f32.gmra.mrb[42].mxu1 %v347_v49 }
 0x170   :  { %2320 = vmatprep.mubr.msk.f32.mxu1 %vm3019_vm0, %v3020_v57 }
 0x171   :  { %v348_v53 = vmax.f32 %v313_v51, 0.0 }
 0x172   :  { %v317_v54 = vpop.f32.mrb[46].mxu0 }
 0x173   :  { %v318_v55 = vadd.f32 %v3426_v61, %v317_v54  ;;  %v319_v56 = vpop.f32.mrb[47].mxu0  ;;  %2321 = vmatmul.mubr.f32.gmra.mrb[44].mxu1 %v348_v53 }
 0x174   :  { %2323 = vmatprep.mubr.msk.f32.mxu1 %vm3019_vm0, %v3020_v57 }
 0x175   :  { %v349_v58 = vmax.f32 %v318_v55, 0.0 }
 0x176   :  { %v322_v59 = vpop.f32.mrb[48].mxu0 }
 0x177   :  { %v323_v60 = vadd.f32 %v3426_v61, %v322_v59  ;;  %v324_v62 = vpop.f32.mrb[49].mxu0  ;;  %2324 = vmatmul.mubr.f32.gmra.mrb[46].mxu1 %v349_v58 }
 0x178   :  { %2326 = vmatprep.mubr.msk.f32.mxu1 %vm3019_vm0, %v3020_v57 }
 0x179   :  { %v350_v63 = vmax.f32 %v323_v60, 0.0 }
 0x17b   :  { %2327 = vmatmul.mubr.f32.gmra.mrb[48].mxu1 %v350_v63 }
 0x17c   :  { %2361 = vmatprep.mubr.msk.f32.mxu1 %vm3019_vm0, %v3020_v57 }
 0x1ee   :  { %v440_v61 = vpop.f32.mrb[0].mxu1 }
 0x1ef   :  { %v441_v2 = vadd.f32 %v3565_v1, %v440_v61  ;;  %v2256_v4 = vpop.f32.mrb[1].mxu1 }
 0x1f1   :  { %v564_v5 = vmax.f32 %v441_v2, 0.0 }
 0x1f2   :  { %v445_v6 = vpop.f32.mrb[2].mxu1 }
 0x1f3   :  { %v446_v7 = vadd.f32 %v3565_v1, %v445_v6  ;;  %v2259_v8 = vpop.f32.mrb[3].mxu1  ;;  %2362 = vmatmul.mubr.f32.vlgmr.msra.gmra.mrb[50].mxu1 %v564_v5 }
 0x1f4   :  { %2364 = vmatprep.mubr.msk.f32.mxu1 %vm3019_vm0, %v3020_v57 }
 0x1f5   :  { %v565_v9 = vmax.f32 %v446_v7, 0.0 }
 0x1f6   :  { %v450_v10 = vpop.f32.mrb[4].mxu1 }
 0x1f7   :  { %v451_v11 = vadd.f32 %v3565_v1, %v450_v10  ;;  %v2262_v12 = vpop.f32.mrb[5].mxu1  ;;  %2365 = vmatmul.mubr.f32.gmra.mrb[52].mxu1 %v565_v9 }
 0x1f8   :  { %2367 = vmatprep.mubr.msk.f32.mxu1 %vm3019_vm0, %v3020_v57 }
 0x1f9   :  { %v566_v13 = vmax.f32 %v451_v11, 0.0 }
 0x1fa   :  { %v455_v14 = vpop.f32.mrb[6].mxu1 }
 0x1fb   :  { %v456_v15 = vadd.f32 %v3565_v1, %v455_v14  ;;  %v2265_v16 = vpop.f32.mrb[7].mxu1  ;;  %2368 = vmatmul.mubr.f32.gmra.mrb[54].mxu1 %v566_v13 }
 0x1fc   :  { %2370 = vmatprep.mubr.msk.f32.mxu1 %vm3019_vm0, %v3020_v57 }
 0x1fd   :  { %v567_v17 = vmax.f32 %v456_v15, 0.0 }
 0x1fe   :  { %v460_v18 = vpop.f32.mrb[8].mxu1 }
 0x1ff   :  { %v461_v19 = vadd.f32 %v3565_v1, %v460_v18  ;;  %v2268_v20 = vpop.f32.mrb[9].mxu1  ;;  %2371 = vmatmul.mubr.f32.gmra.mrb[56].mxu1 %v567_v17 }
 0x200   :  { %2373 = vmatprep.mubr.msk.f32.mxu1 %vm3019_vm0, %v3020_v57 }
 0x201   :  { %v568_v21 = vmax.f32 %v461_v19, 0.0 }
 0x202   :  { %v465_v22 = vpop.f32.mrb[10].mxu1 }
 0x203   :  { %v466_v23 = vadd.f32 %v3565_v1, %v465_v22  ;;  %v2271_v24 = vpop.f32.mrb[11].mxu1  ;;  %2374 = vmatmul.mubr.f32.gmra.mrb[58].mxu1 %v568_v21 }
 0x204   :  { %2376 = vmatprep.mubr.msk.f32.mxu1 %vm3019_vm0, %v3020_v57 }
 0x205   :  { %v569_v25 = vmax.f32 %v466_v23, 0.0 }
 0x206   :  { %v470_v26 = vpop.f32.mrb[12].mxu1 }
 0x207   :  { %v471_v27 = vadd.f32 %v3565_v1, %v470_v26  ;;  %v2274_v28 = vpop.f32.mrb[13].mxu1  ;;  %2377 = vmatmul.mubr.f32.gmra.mrb[60].mxu1 %v569_v25 }
 0x208   :  { %2379 = vmatprep.mubr.msk.f32.mxu1 %vm3019_vm0, %v3020_v57 }
 0x209   :  { %v570_v29 = vmax.f32 %v471_v27, 0.0 }
 0x20a   :  { %v475_v30 = vpop.f32.mrb[14].mxu1 }
 0x20b   :  { %v476_v31 = vadd.f32 %v3565_v1, %v475_v30  ;;  %v2277_v32 = vpop.f32.mrb[15].mxu1  ;;  %2380 = vmatmul.mubr.f32.gmra.mrb[62].mxu1 %v570_v29 }
 0x20c   :  { %2382 = vmatprep.mubr.msk.f32.mxu1 %vm3019_vm0, %v3020_v57 }
 0x20d   :  { %v571_v33 = vmax.f32 %v476_v31, 0.0 }
 0x20e   :  { %v480_v34 = vpop.f32.mrb[16].mxu1 }
 0x20f   :  { %v481_v35 = vadd.f32 %v3565_v1, %v480_v34  ;;  %v2280_v36 = vpop.f32.mrb[17].mxu1  ;;  %2383 = vmatmul.mubr.f32.gmra.mrb[64].mxu1 %v571_v33 }
 0x210   :  { %2385 = vmatprep.mubr.msk.f32.mxu1 %vm3019_vm0, %v3020_v57 }
 0x211   :  { %v572_v37 = vmax.f32 %v481_v35, 0.0 }
 0x212   :  { %v485_v38 = vpop.f32.mrb[18].mxu1 }
 0x213   :  { %v486_v39 = vadd.f32 %v3565_v1, %v485_v38  ;;  %v2283_v40 = vpop.f32.mrb[19].mxu1  ;;  %2386 = vmatmul.mubr.f32.gmra.mrb[66].mxu1 %v572_v37 }
 0x214   :  { %2388 = vmatprep.mubr.msk.f32.mxu1 %vm3019_vm0, %v3020_v57 }
 0x215   :  { %v573_v41 = vmax.f32 %v486_v39, 0.0 }
 0x216   :  { %v490_v42 = vpop.f32.mrb[20].mxu1 }
 0x217   :  { %v491_v43 = vadd.f32 %v3565_v1, %v490_v42  ;;  %v2286_v44 = vpop.f32.mrb[21].mxu1  ;;  %2389 = vmatmul.mubr.f32.gmra.mrb[68].mxu1 %v573_v41  ;;  %v1101_v41 = vld [vmem:[%s4207_s9] sm:$0xff]  ;;  %v1102_v42 = vld [vmem:[%s4207_s9 + $0x8] sm:$0xff] }
 0x218   :  { %2391 = vmatprep.mubr.msk.f32.mxu1 %vm3019_vm0, %v3020_v57  ;;  %v1104_v44 = vld [vmem:[%s4207_s9 + $0x18] sm:$0xff] }
 0x219   :  { %v574_v45 = vmax.f32 %v491_v43, 0.0  ;;  %v2717_v43 = vpack.c.bf16 %v1102_v42, %v1101_v41 }
 0x21a   :  { %v495_v46 = vpop.f32.mrb[22].mxu1 }
 0x21b   :  { %v496_v47 = vadd.f32 %v3565_v1, %v495_v46  ;;  %v2289_v48 = vpop.f32.mrb[23].mxu1  ;;  %2392 = vmatmul.mubr.f32.gmra.mrb[70].mxu1 %v574_v45  ;;  %v1105_v46 = vld [vmem:[%s4207_s9 + $0x20] sm:$0xff] }
 0x21c   :  { %2394 = vmatprep.mubr.msk.f32.mxu1 %vm3019_vm0, %v3020_v57  ;;  %2718 = vmatpush3.bf16.msra.mxu1 %v2717_v43 }
 0x21d   :  { %v575_v49 = vmax.f32 %v496_v47, 0.0  ;;  %2719 = vmatprep.subr.bf16.mxu1 %v3018_v3  ;;  %v1106_v47 = vld [vmem:[%s4207_s9 + $0x28] sm:$0xff] }
 0x21e   :  { %v500_v50 = vpop.f32.mrb[24].mxu1  ;;  %v2723_v48 = vpack.c.bf16 %v1106_v47, %v1105_v46 }
 0x21f   :  { %v501_v51 = vadd.f32 %v3565_v1, %v500_v50  ;;  %v2292_v52 = vpop.f32.mrb[25].mxu1  ;;  %2395 = vmatmul.mubr.f32.gmra.mrb[72].mxu1 %v575_v49  ;;  %v1107_v49 = vld [vmem:[%s4207_s9 + $0x30] sm:$0xff]  ;;  %v1108_v50 = vld [vmem:[%s4207_s9 + $0x38] sm:$0xff] }
 0x220   :  { %2397 = vmatprep.mubr.msk.f32.mxu1 %vm3019_vm0, %v3020_v57  ;;  %v1109_v52 = vld [vmem:[%s4207_s9 + $0x40] sm:$0xff] }
 0x221   :  { %v576_v53 = vmax.f32 %v501_v51, 0.0  ;;  %v2726_v51 = vpack.c.bf16 %v1108_v50, %v1107_v49 }
 0x222   :  { %v505_v54 = vpop.f32.mrb[26].mxu1 }
 0x223   :  { %v506_v55 = vadd.f32 %v3565_v1, %v505_v54  ;;  %v2295_v56 = vpop.f32.mrb[27].mxu1  ;;  %2398 = vmatmul.mubr.f32.gmra.mrb[74].mxu1 %v576_v53  ;;  %v1110_v53 = vld [vmem:[%s4207_s9 + $0x48] sm:$0xff] }
 0x224   :  { %2400 = vmatprep.mubr.msk.f32.mxu1 %vm3019_vm0, %v3020_v57  ;;  %v2729_v54 = vpack.c.bf16 %v1110_v53, %v1109_v52  ;;  %v1112_v56 = vld [vmem:[%s4207_s9 + $0x58] sm:$0xff] }
 0x225   :  { %v577_v58 = vmax.f32 %v506_v55, 0.0  ;;  %v1111_v55 = vld [vmem:[%s4207_s9 + $0x50] sm:$0xff] }
 0x226   :  { %v510_v59 = vpop.f32.mrb[28].mxu1 }
 0x227   :  { %v511_v60 = vadd.f32 %v3565_v1, %v510_v59  ;;  %v2298_v62 = vpop.f32.mrb[29].mxu1  ;;  %2401 = vmatmul.mubr.f32.gmra.mrb[76].mxu1 %v577_v58  ;;  %v2732_v58 = vpack.c.bf16 %v1112_v56, %v1111_v55  ;;  %v1113_v59 = vld [vmem:[%s4207_s9 + $0x60] sm:$0xff] }
 0x228   :  { %2403 = vmatprep.mubr.msk.f32.mxu1 %vm3019_vm0, %v3020_v57 }
 0x229   :  { %v578_v63 = vmax.f32 %v511_v60, 0.0  ;;  %v1114_v60 = vld [vmem:[%s4207_s9 + $0x68] sm:$0xff] }
 0x22a   :  { %v515_v0 = vpop.f32.mrb[30].mxu1  ;;  %v2735_v62 = vpack.c.bf16 %v1114_v60, %v1113_v59 }
 0x22b   :  { %v516_v61 = vadd.f32 %v3565_v1, %v515_v0  ;;  %v2301_v2 = vpop.f32.mrb[31].mxu1  ;;  %2404 = vmatmul.mubr.f32.gmra.mrb[78].mxu1 %v578_v63  ;;  %v1115_v63 = vld [vmem:[%s4207_s9 + $0x70] sm:$0xff]  ;;  %v1116_v0 = vld [vmem:[%s4207_s9 + $0x78] sm:$0xff] }
 0x22c   :  { %2406 = vmatprep.mubr.msk.f32.mxu1 %vm3019_vm0, %v3020_v57  ;;  %v2738_v2 = vpack.c.bf16 %v1116_v0, %v1115_v63 }
 0x22d   :  { %v579_v4 = vmax.f32 %v516_v61, 0.0  ;;  %v3699_v61 = vld [vmem:[%s4204_s6] ss:$0 sm:$0xff] }
 0x22e   :  { %v520_v5 = vpop.f32.mrb[32].mxu1 }
 0x22f   :  { %v521_v6 = vadd.f32 %v3565_v1, %v520_v5  ;;  %v2304_v7 = vpop.f32.mrb[33].mxu1  ;;  %2407 = vmatmul.mubr.f32.gmra.mrb[80].mxu1 %v579_v4 }
 0x230   :  { %2409 = vmatprep.mubr.msk.f32.mxu1 %vm3019_vm0, %v3020_v57 }
 0x231   :  { %v580_v8 = vmax.f32 %v521_v6, 0.0 }
 0x232   :  { %v525_v9 = vpop.f32.mrb[34].mxu1 }
 0x233   :  { %v526_v10 = vadd.f32 %v3565_v1, %v525_v9  ;;  %v2307_v11 = vpop.f32.mrb[35].mxu1  ;;  %2410 = vmatmul.mubr.f32.gmra.mrb[82].mxu1 %v580_v8 }
 0x234   :  { %2412 = vmatprep.mubr.msk.f32.mxu1 %vm3019_vm0, %v3020_v57 }
 0x235   :  { %v581_v12 = vmax.f32 %v526_v10, 0.0 }
 0x236   :  { %v530_v13 = vpop.f32.mrb[36].mxu1 }
 0x237   :  { %v531_v14 = vadd.f32 %v3565_v1, %v530_v13  ;;  %v2310_v15 = vpop.f32.mrb[37].mxu1  ;;  %2413 = vmatmul.mubr.f32.gmra.mrb[84].mxu1 %v581_v12 }
 0x238   :  { %2415 = vmatprep.mubr.msk.f32.mxu1 %vm3019_vm0, %v3020_v57 }
 0x239   :  { %v582_v16 = vmax.f32 %v531_v14, 0.0 }
 0x23a   :  { %v535_v17 = vpop.f32.mrb[38].mxu1 }
 0x23b   :  { %v536_v18 = vadd.f32 %v3565_v1, %v535_v17  ;;  %v2313_v19 = vpop.f32.mrb[39].mxu1  ;;  %2416 = vmatmul.mubr.f32.gmra.mrb[86].mxu1 %v582_v16 }
 0x23c   :  { %2418 = vmatprep.mubr.msk.f32.mxu1 %vm3019_vm0, %v3020_v57 }
 0x23d   :  { %v583_v20 = vmax.f32 %v536_v18, 0.0 }
 0x23e   :  { %v540_v21 = vpop.f32.mrb[40].mxu1 }
 0x23f   :  { %v541_v22 = vadd.f32 %v3565_v1, %v540_v21  ;;  %v2316_v23 = vpop.f32.mrb[41].mxu1  ;;  %2419 = vmatmul.mubr.f32.gmra.mrb[88].mxu1 %v583_v20 }
 0x240   :  { %2421 = vmatprep.mubr.msk.f32.mxu1 %vm3019_vm0, %v3020_v57 }
 0x241   :  { %v584_v24 = vmax.f32 %v541_v22, 0.0 }
 0x242   :  { %v545_v25 = vpop.f32.mrb[42].mxu1 }
 0x243   :  { %v546_v26 = vadd.f32 %v3565_v1, %v545_v25  ;;  %v2319_v27 = vpop.f32.mrb[43].mxu1  ;;  %2422 = vmatmul.mubr.f32.gmra.mrb[90].mxu1 %v584_v24 }
 0x244   :  { %2424 = vmatprep.mubr.msk.f32.mxu1 %vm3019_vm0, %v3020_v57 }
 0x245   :  { %v585_v28 = vmax.f32 %v546_v26, 0.0 }
 0x246   :  { %v550_v29 = vpop.f32.mrb[44].mxu1 }
 0x247   :  { %v551_v30 = vadd.f32 %v3565_v1, %v550_v29  ;;  %v2322_v31 = vpop.f32.mrb[45].mxu1  ;;  %2425 = vmatmul.mubr.f32.gmra.mrb[92].mxu1 %v585_v28 }
 0x248   :  { %2427 = vmatprep.mubr.msk.f32.mxu1 %vm3019_vm0, %v3020_v57 }
 0x249   :  { %v586_v32 = vmax.f32 %v551_v30, 0.0 }
 0x24a   :  { %v555_v33 = vpop.f32.mrb[46].mxu1 }
 0x24b   :  { %v556_v34 = vadd.f32 %v3565_v1, %v555_v33  ;;  %v2325_v35 = vpop.f32.mrb[47].mxu1  ;;  %2428 = vmatmul.mubr.f32.gmra.mrb[94].mxu1 %v586_v32 }
 0x24c   :  { %2430 = vmatprep.mubr.msk.f32.mxu1 %vm3019_vm0, %v3020_v57 }
 0x24d   :  { %v587_v36 = vmax.f32 %v556_v34, 0.0 }
 0x24e   :  { %v560_v37 = vpop.f32.mrb[48].mxu1 }
 0x24f   :  { %v561_v38 = vadd.f32 %v3565_v1, %v560_v37  ;;  %v2328_v39 = vpop.f32.mrb[49].mxu1  ;;  %2431 = vmatmul.mubr.f32.gmra.mrb[96].mxu1 %v587_v36  ;;  %v1103_v1 = vld [vmem:[%s4207_s9 + $0x10] sm:$0xff] }
 0x250   :  { %2433 = vmatprep.mubr.msk.f32.mxu1 %vm3019_vm0, %v3020_v57  ;;  %v2720_v45 = vpack.c.bf16 %v1104_v44, %v1103_v1 }
 0x251   :  { %v588_v40 = vmax.f32 %v561_v38, 0.0 }
 0x252   :  { %2721 = vmatpush3.bf16.msra.mxu1 %v2720_v45 }
 0x253   :  { %2434 = vmatmul.mubr.f32.gmra.mrb[98].mxu1 %v588_v40  ;;  %2722 = vmatprep.subr.bf16.mxu1 %v3018_v3 }
 0x254   :  { %2545 = vmatprep.mubr.msk.f32.mxu1 %vm3019_vm0, %v3020_v57 }
 0x256   :  { %2724 = vmatpush3.bf16.msra.mxu1 %v2723_v48 }
 0x257   :  { %2725 = vmatprep.subr.bf16.mxu1 %v3018_v3 }
 0x25a   :  { %2727 = vmatpush3.bf16.msra.mxu1 %v2726_v51 }
 0x25b   :  { %2728 = vmatprep.subr.bf16.mxu1 %v3018_v3 }
 0x25e   :  { %2730 = vmatpush3.bf16.msra.mxu1 %v2729_v54 }
 0x25f   :  { %2731 = vmatprep.subr.bf16.mxu1 %v3018_v3 }
 0x262   :  { %2733 = vmatpush3.bf16.msra.mxu1 %v2732_v58 }
 0x263   :  { %2734 = vmatprep.subr.bf16.mxu1 %v3018_v3 }
 0x266   :  { %2736 = vmatpush3.bf16.msra.mxu1 %v2735_v62 }
 0x267   :  { %2737 = vmatprep.subr.bf16.mxu1 %v3018_v3 }
 0x26a   :  { %2739 = vmatpush3.bf16.msra.mxu1 %v2738_v2 }
 0x2c6   :  { %v678_v4 = vpop.f32.mrb[50].mxu1 }
 0x2c7   :  { %v679_v5 = vadd.f32 %v3699_v61, %v678_v4  ;;  %v2363_v6 = vpop.f32.mrb[51].mxu1 }
 0x2c9   :  { %1948 = vst.msk [vmem:[%s4212_s14] sm:$0xff] %vm810_vm1, %v679_v5  ;;  %2439 = vmatmul.mubr.msk.f32.vlgmr.msra.gmra.mrb[50].mxu0 %vm810_vm1, %v679_v5 }
 0x2ca   :  { %v683_v7 = vpop.f32.mrb[52].mxu1  ;;  %2441 = vmatprep.mubr.msk.f32.mxu0 %vm3019_vm0, %v3020_v57 }
 0x2cb   :  { %v684_v8 = vadd.f32 %v3699_v61, %v683_v7  ;;  %v2366_v3 = vpop.f32.mrb[53].mxu1 }
 0x2cd   :  { %1949 = vst.msk [vmem:[%s4212_s14 + $0x8] sm:$0xff] %vm810_vm1, %v684_v8  ;;  %2442 = vmatmul.mubr.msk.f32.gmra.mrb[52].mxu0 %vm810_vm1, %v684_v8 }
 0x2ce   :  { %v688_v9 = vpop.f32.mrb[54].mxu1  ;;  %2444 = vmatprep.mubr.msk.f32.mxu0 %vm3019_vm0, %v3020_v57 }
 0x2cf   :  { %v689_v10 = vadd.f32 %v3699_v61, %v688_v9  ;;  %v2369_v11 = vpop.f32.mrb[55].mxu1 }
 0x2d1   :  { %1950 = vst.msk [vmem:[%s4212_s14 + $0x10] sm:$0xff] %vm810_vm1, %v689_v10  ;;  %2445 = vmatmul.mubr.msk.f32.gmra.mrb[54].mxu0 %vm810_vm1, %v689_v10 }
 0x2d2   :  { %v693_v12 = vpop.f32.mrb[56].mxu1  ;;  %2447 = vmatprep.mubr.msk.f32.mxu0 %vm3019_vm0, %v3020_v57 }
 0x2d3   :  { %v694_v13 = vadd.f32 %v3699_v61, %v693_v12  ;;  %v2372_v14 = vpop.f32.mrb[57].mxu1 }
 0x2d5   :  { %1951 = vst.msk [vmem:[%s4212_s14 + $0x18] sm:$0xff] %vm810_vm1, %v694_v13  ;;  %2448 = vmatmul.mubr.msk.f32.gmra.mrb[56].mxu0 %vm810_vm1, %v694_v13 }
 0x2d6   :  { %v698_v15 = vpop.f32.mrb[58].mxu1  ;;  %2450 = vmatprep.mubr.msk.f32.mxu0 %vm3019_vm0, %v3020_v57 }
 0x2d7   :  { %v699_v16 = vadd.f32 %v3699_v61, %v698_v15  ;;  %v2375_v17 = vpop.f32.mrb[59].mxu1 }
 0x2d8   :  { %v1342_v17 = vld [vmem:[%s4209_s11 + $0x18] sm:$0xff] }
 0x2d9   :  { %1952 = vst.msk [vmem:[%s4212_s14 + $0x20] sm:$0xff] %vm810_vm1, %v699_v16  ;;  %2451 = vmatmul.mubr.msk.f32.gmra.mrb[58].mxu0 %vm810_vm1, %v699_v16  ;;  %v1340_v16 = vld [vmem:[%s4209_s11 + $0x8] sm:$0xff] }
 0x2da   :  { %v703_v18 = vpop.f32.mrb[60].mxu1  ;;  %2453 = vmatprep.mubr.msk.f32.mxu0 %vm3019_vm0, %v3020_v57 }
 0x2db   :  { %v704_v19 = vadd.f32 %v3699_v61, %v703_v18  ;;  %v2378_v20 = vpop.f32.mrb[61].mxu1  ;;  %v2740_v18 = vpack.c.bf16 %v1342_v17, %v1340_v16 }
 0x2dc   :  { %v1344_v20 = vld [vmem:[%s4209_s11 + $0x28] sm:$0xff] }
 0x2dd   :  { %1953 = vst.msk [vmem:[%s4212_s14 + $0x28] sm:$0xff] %vm810_vm1, %v704_v19  ;;  %2454 = vmatmul.mubr.msk.f32.gmra.mrb[60].mxu0 %vm810_vm1, %v704_v19  ;;  %v1341_v19 = vld [vmem:[%s4209_s11 + $0x10] sm:$0xff]  ;;  %2741 = vmatprep.subr.bf16.mxu0 %v2740_v18 }
 0x2de   :  { %v708_v21 = vpop.f32.mrb[62].mxu1  ;;  %2456 = vmatprep.mubr.msk.f32.mxu0 %vm3019_vm0, %v3020_v57  ;;  %2772 = vmatprep.subr.bf16.mxu1 %v2740_v18 }
 0x2df   :  { %v709_v22 = vadd.f32 %v3699_v61, %v708_v21  ;;  %v2381_v23 = vpop.f32.mrb[63].mxu1  ;;  %v1346_v21 = vld [vmem:[%s4209_s11 + $0x38] sm:$0xff] }
 0x2e0   :  { %v2744_v23 = vpack.c.bf16 %v1346_v21, %v1344_v20 }
 0x2e1   :  { %1954 = vst.msk [vmem:[%s4212_s14 + $0x30] sm:$0xff] %vm810_vm1, %v709_v22  ;;  %2457 = vmatmul.mubr.msk.f32.gmra.mrb[62].mxu0 %vm810_vm1, %v709_v22 }
 0x2e2   :  { %v713_v24 = vpop.f32.mrb[64].mxu1  ;;  %2459 = vmatprep.mubr.msk.f32.mxu0 %vm3019_vm0, %v3020_v57 }
 0x2e3   :  { %v714_v25 = vadd.f32 %v3699_v61, %v713_v24  ;;  %v2384_v26 = vpop.f32.mrb[65].mxu1  ;;  %v1343_v24 = vld [vmem:[%s4209_s11 + $0x20] sm:$0xff] }
 0x2e4   :  { %v1348_v26 = vld [vmem:[%s4209_s11 + $0x48] sm:$0xff] }
 0x2e5   :  { %1955 = vst.msk [vmem:[%s4212_s14 + $0x38] sm:$0xff] %vm810_vm1, %v714_v25  ;;  %2460 = vmatmul.mubr.msk.f32.gmra.mrb[64].mxu0 %vm810_vm1, %v714_v25  ;;  %v1345_v25 = vld [vmem:[%s4209_s11 + $0x30] sm:$0xff] }
 0x2e6   :  { %v718_v27 = vpop.f32.mrb[66].mxu1  ;;  %2462 = vmatprep.mubr.msk.f32.mxu0 %vm3019_vm0, %v3020_v57 }
 0x2e7   :  { %v719_v28 = vadd.f32 %v3699_v61, %v718_v27  ;;  %v2387_v29 = vpop.f32.mrb[67].mxu1  ;;  %v1350_v27 = vld [vmem:[%s4209_s11 + $0x58] sm:$0xff] }
 0x2e8   :  { %v2748_v29 = vpack.c.bf16 %v1350_v27, %v1348_v26 }
 0x2e9   :  { %1956 = vst.msk [vmem:[%s4212_s14 + $0x40] sm:$0xff] %vm810_vm1, %v719_v28  ;;  %2463 = vmatmul.mubr.msk.f32.gmra.mrb[66].mxu0 %vm810_vm1, %v719_v28  ;;  %v2746_v28 = vpack.c.bf16 %v1345_v25, %v1343_v24 }
 0x2ea   :  { %v723_v30 = vpop.f32.mrb[68].mxu1  ;;  %2465 = vmatprep.mubr.msk.f32.mxu0 %vm3019_vm0, %v3020_v57 }
 0x2eb   :  { %v724_v31 = vadd.f32 %v3699_v61, %v723_v30  ;;  %v2390_v32 = vpop.f32.mrb[69].mxu1  ;;  %v1347_v30 = vld [vmem:[%s4209_s11 + $0x40] sm:$0xff] }
 0x2ec   :  { %v1352_v32 = vld [vmem:[%s4209_s11 + $0x68] sm:$0xff] }
 0x2ed   :  { %1957 = vst.msk [vmem:[%s4212_s14 + $0x48] sm:$0xff] %vm810_vm1, %v724_v31  ;;  %2466 = vmatmul.mubr.msk.f32.gmra.mrb[68].mxu0 %vm810_vm1, %v724_v31  ;;  %v1349_v31 = vld [vmem:[%s4209_s11 + $0x50] sm:$0xff] }
 0x2ee   :  { %v728_v33 = vpop.f32.mrb[70].mxu1  ;;  %2468 = vmatprep.mubr.msk.f32.mxu0 %vm3019_vm0, %v3020_v57 }
 0x2ef   :  { %v729_v34 = vadd.f32 %v3699_v61, %v728_v33  ;;  %v2393_v35 = vpop.f32.mrb[71].mxu1  ;;  %v1354_v33 = vld [vmem:[%s4209_s11 + $0x78] sm:$0xff] }
 0x2f0   :  { %v2752_v35 = vpack.c.bf16 %v1354_v33, %v1352_v32 }
 0x2f1   :  { %1958 = vst.msk [vmem:[%s4212_s14 + $0x50] sm:$0xff] %vm810_vm1, %v729_v34  ;;  %2469 = vmatmul.mubr.msk.f32.gmra.mrb[70].mxu0 %vm810_vm1, %v729_v34  ;;  %v2750_v34 = vpack.c.bf16 %v1349_v31, %v1347_v30 }
 0x2f2   :  { %v733_v36 = vpop.f32.mrb[72].mxu1  ;;  %2471 = vmatprep.mubr.msk.f32.mxu0 %vm3019_vm0, %v3020_v57 }
 0x2f3   :  { %v734_v37 = vadd.f32 %v3699_v61, %v733_v36  ;;  %v2396_v38 = vpop.f32.mrb[73].mxu1  ;;  %v1351_v36 = vld [vmem:[%s4209_s11 + $0x60] sm:$0xff] }
 0x2f4   :  { %v1356_v38 = vld [vmem:[%s4209_s11 + $0x88] sm:$0xff] }
 0x2f5   :  { %1959 = vst.msk [vmem:[%s4212_s14 + $0x58] sm:$0xff] %vm810_vm1, %v734_v37  ;;  %2472 = vmatmul.mubr.msk.f32.gmra.mrb[72].mxu0 %vm810_vm1, %v734_v37  ;;  %v1353_v37 = vld [vmem:[%s4209_s11 + $0x70] sm:$0xff] }
 0x2f6   :  { %v738_v39 = vpop.f32.mrb[74].mxu1  ;;  %2474 = vmatprep.mubr.msk.f32.mxu0 %vm3019_vm0, %v3020_v57 }
 0x2f7   :  { %v739_v40 = vadd.f32 %v3699_v61, %v738_v39  ;;  %v2399_v41 = vpop.f32.mrb[75].mxu1  ;;  %v1358_v39 = vld [vmem:[%s4209_s11 + $0x98] sm:$0xff] }
 0x2f8   :  { %v2756_v41 = vpack.c.bf16 %v1358_v39, %v1356_v38 }
 0x2f9   :  { %1960 = vst.msk [vmem:[%s4212_s14 + $0x60] sm:$0xff] %vm810_vm1, %v739_v40  ;;  %2475 = vmatmul.mubr.msk.f32.gmra.mrb[74].mxu0 %vm810_vm1, %v739_v40  ;;  %v2754_v40 = vpack.c.bf16 %v1353_v37, %v1351_v36 }
 0x2fa   :  { %v743_v42 = vpop.f32.mrb[76].mxu1  ;;  %2477 = vmatprep.mubr.msk.f32.mxu0 %vm3019_vm0, %v3020_v57 }
 0x2fb   :  { %v744_v1 = vadd.f32 %v3699_v61, %v743_v42  ;;  %v2402_v43 = vpop.f32.mrb[77].mxu1  ;;  %v1355_v42 = vld [vmem:[%s4209_s11 + $0x80] sm:$0xff] }
 0x2fc   :  { %v1360_v43 = vld [vmem:[%s4209_s11 + $0xa8] sm:$0xff] }
 0x2fd   :  { %1961 = vst.msk [vmem:[%s4212_s14 + $0x68] sm:$0xff] %vm810_vm1, %v744_v1  ;;  %2478 = vmatmul.mubr.msk.f32.gmra.mrb[76].mxu0 %vm810_vm1, %v744_v1  ;;  %v1357_v1 = vld [vmem:[%s4209_s11 + $0x90] sm:$0xff] }
 0x2fe   :  { %v748_v44 = vpop.f32.mrb[78].mxu1  ;;  %2480 = vmatprep.mubr.msk.f32.mxu0 %vm3019_vm0, %v3020_v57 }
 0x2ff   :  { %v749_v45 = vadd.f32 %v3699_v61, %v748_v44  ;;  %v2405_v46 = vpop.f32.mrb[79].mxu1  ;;  %v1362_v44 = vld [vmem:[%s4209_s11 + $0xb8] sm:$0xff] }
 0x300   :  { %v2760_v46 = vpack.c.bf16 %v1362_v44, %v1360_v43 }
 0x301   :  { %1962 = vst.msk [vmem:[%s4212_s14 + $0x70] sm:$0xff] %vm810_vm1, %v749_v45  ;;  %2481 = vmatmul.mubr.msk.f32.gmra.mrb[78].mxu0 %vm810_vm1, %v749_v45  ;;  %v2758_v45 = vpack.c.bf16 %v1357_v1, %v1355_v42 }
 0x302   :  { %v753_v47 = vpop.f32.mrb[80].mxu1  ;;  %2483 = vmatprep.mubr.msk.f32.mxu0 %vm3019_vm0, %v3020_v57 }
 0x303   :  { %v754_v48 = vadd.f32 %v3699_v61, %v753_v47  ;;  %v2408_v49 = vpop.f32.mrb[81].mxu1  ;;  %v1359_v47 = vld [vmem:[%s4209_s11 + $0xa0] sm:$0xff] }
 0x304   :  { %v1364_v49 = vld [vmem:[%s4209_s11 + $0xc8] sm:$0xff] }
 0x305   :  { %1963 = vst.msk [vmem:[%s4212_s14 + $0x78] sm:$0xff] %vm810_vm1, %v754_v48  ;;  %2484 = vmatmul.mubr.msk.f32.gmra.mrb[80].mxu0 %vm810_vm1, %v754_v48  ;;  %v1361_v48 = vld [vmem:[%s4209_s11 + $0xb0] sm:$0xff] }
 0x306   :  { %v758_v50 = vpop.f32.mrb[82].mxu1  ;;  %2486 = vmatprep.mubr.msk.f32.mxu0 %vm3019_vm0, %v3020_v57 }
 0x307   :  { %v759_v51 = vadd.f32 %v3699_v61, %v758_v50  ;;  %v2411_v52 = vpop.f32.mrb[83].mxu1  ;;  %v1366_v50 = vld [vmem:[%s4209_s11 + $0xd8] sm:$0xff] }
 0x308   :  { %v2764_v52 = vpack.c.bf16 %v1366_v50, %v1364_v49 }
 0x309   :  { %1964 = vst.msk [vmem:[%s4212_s14 + $0x80] sm:$0xff] %vm810_vm1, %v759_v51  ;;  %2487 = vmatmul.mubr.msk.f32.gmra.mrb[82].mxu0 %vm810_vm1, %v759_v51  ;;  %v2762_v51 = vpack.c.bf16 %v1361_v48, %v1359_v47 }
 0x30a   :  { %v763_v53 = vpop.f32.mrb[84].mxu1  ;;  %2489 = vmatprep.mubr.msk.f32.mxu0 %vm3019_vm0, %v3020_v57 }
 0x30b   :  { %v764_v54 = vadd.f32 %v3699_v61, %v763_v53  ;;  %v2414_v55 = vpop.f32.mrb[85].mxu1  ;;  %v1363_v53 = vld [vmem:[%s4209_s11 + $0xc0] sm:$0xff] }
 0x30d   :  { %1965 = vst.msk [vmem:[%s4212_s14 + $0x88] sm:$0xff] %vm810_vm1, %v764_v54  ;;  %2490 = vmatmul.mubr.msk.f32.gmra.mrb[84].mxu0 %vm810_vm1, %v764_v54  ;;  %v1365_v54 = vld [vmem:[%s4209_s11 + $0xd0] sm:$0xff] }
 0x30e   :  { %v768_v56 = vpop.f32.mrb[86].mxu1  ;;  %2492 = vmatprep.mubr.msk.f32.mxu0 %vm3019_vm0, %v3020_v57  ;;  %v2766_v55 = vpack.c.bf16 %v1365_v54, %v1363_v53 }
 0x30f   :  { %v769_v58 = vadd.f32 %v3699_v61, %v768_v56  ;;  %v2417_v59 = vpop.f32.mrb[87].mxu1  ;;  %v3988_v56 = vld [vmem:[%s4206_s8] ss:$0 sm:$0xff] }
 0x311   :  { %1966 = vst.msk [vmem:[%s4212_s14 + $0x90] sm:$0xff] %vm810_vm1, %v769_v58  ;;  %2493 = vmatmul.mubr.msk.f32.gmra.mrb[86].mxu0 %vm810_vm1, %v769_v58 }
 0x312   :  { %v773_v60 = vpop.f32.mrb[88].mxu1  ;;  %2495 = vmatprep.mubr.msk.f32.mxu0 %vm3019_vm0, %v3020_v57 }
 0x313   :  { %v774_v62 = vadd.f32 %v3699_v61, %v773_v60  ;;  %v2420_v63 = vpop.f32.mrb[89].mxu1 }
 0x315   :  { %1967 = vst.msk [vmem:[%s4212_s14 + $0x98] sm:$0xff] %vm810_vm1, %v774_v62  ;;  %2496 = vmatmul.mubr.msk.f32.gmra.mrb[88].mxu0 %vm810_vm1, %v774_v62 }
 0x316   :  { %v778_v0 = vpop.f32.mrb[90].mxu1  ;;  %2498 = vmatprep.mubr.msk.f32.mxu0 %vm3019_vm0, %v3020_v57 }
 0x317   :  { %v779_v2 = vadd.f32 %v3699_v61, %v778_v0  ;;  %v2423_v4 = vpop.f32.mrb[91].mxu1 }
 0x319   :  { %1968 = vst.msk [vmem:[%s4212_s14 + $0xa0] sm:$0xff] %vm810_vm1, %v779_v2  ;;  %2499 = vmatmul.mubr.msk.f32.gmra.mrb[90].mxu0 %vm810_vm1, %v779_v2 }
 0x31a   :  { %v783_v5 = vpop.f32.mrb[92].mxu1  ;;  %2501 = vmatprep.mubr.msk.f32.mxu0 %vm3019_vm0, %v3020_v57 }
 0x31b   :  { %v784_v6 = vadd.f32 %v3699_v61, %v783_v5  ;;  %v2426_v7 = vpop.f32.mrb[93].mxu1 }
 0x31d   :  { %1969 = vst.msk [vmem:[%s4212_s14 + $0xa8] sm:$0xff] %vm810_vm1, %v784_v6  ;;  %2502 = vmatmul.mubr.msk.f32.gmra.mrb[92].mxu0 %vm810_vm1, %v784_v6 }
 0x31e   :  { %v788_v8 = vpop.f32.mrb[94].mxu1  ;;  %2504 = vmatprep.mubr.msk.f32.mxu0 %vm3019_vm0, %v3020_v57 }
 0x31f   :  { %v789_v3 = vadd.f32 %v3699_v61, %v788_v8  ;;  %v2429_v9 = vpop.f32.mrb[95].mxu1 }
 0x321   :  { %1970 = vst.msk [vmem:[%s4212_s14 + $0xb0] sm:$0xff] %vm810_vm1, %v789_v3  ;;  %2505 = vmatmul.mubr.msk.f32.gmra.mrb[94].mxu0 %vm810_vm1, %v789_v3 }
 0x322   :  { %v793_v10 = vpop.f32.mrb[96].mxu1  ;;  %2507 = vmatprep.mubr.msk.f32.mxu0 %vm3019_vm0, %v3020_v57 }
 0x323   :  { %v794_v11 = vadd.f32 %v3699_v61, %v793_v10  ;;  %v2432_v12 = vpop.f32.mrb[97].mxu1 }
 0x325   :  { %1971 = vst.msk [vmem:[%s4212_s14 + $0xb8] sm:$0xff] %vm810_vm1, %v794_v11  ;;  %2508 = vmatmul.mubr.msk.f32.gmra.mrb[96].mxu0 %vm810_vm1, %v794_v11 }
 0x326   :  { %v798_v13 = vpop.f32.mrb[98].mxu1  ;;  %2510 = vmatprep.mubr.msk.f32.mxu0 %vm3019_vm0, %v3020_v57 }
 0x327   :  { %v799_v14 = vadd.f32 %v3699_v61, %v798_v13  ;;  %v2435_v15 = vpop.f32.mrb[99].mxu1  ;;  %v1339_v61 = vld [vmem:[%s4209_s11] sm:$0xff] }
 0x328   :  { %v2742_v22 = vpack.c.bf16 %v1341_v19, %v1339_v61 }
 0x329   :  { %1972 = vst.msk [vmem:[%s4212_s14 + $0xc0] sm:$0xff] %vm810_vm1, %v799_v14  ;;  %2511 = vmatmul.mubr.msk.f32.gmra.mrb[98].mxu0 %vm810_vm1, %v799_v14 }
 0x32a   :  { %1447 = vmatprep.mubr.f32.mxu0 %v3020_v57  ;;  %2743 = vmatpush1.bf16.msra.mxu0 %v2742_v22 }
 0x32b   :  { %2745 = vmatprep.subr.bf16.mxu0 %v2744_v23 }
 0x32e   :  { %2747 = vmatpush1.bf16.msra.mxu0 %v2746_v28 }
 0x32f   :  { %2749 = vmatprep.subr.bf16.mxu0 %v2748_v29 }
 0x332   :  { %2751 = vmatpush1.bf16.msra.mxu0 %v2750_v34 }
 0x333   :  { %2753 = vmatprep.subr.bf16.mxu0 %v2752_v35 }
 0x336   :  { %2755 = vmatpush1.bf16.msra.mxu0 %v2754_v40 }
 0x337   :  { %2757 = vmatprep.subr.bf16.mxu0 %v2756_v41 }
 0x33a   :  { %2759 = vmatpush1.bf16.msra.mxu0 %v2758_v45 }
 0x33b   :  { %2761 = vmatprep.subr.bf16.mxu0 %v2760_v46 }
 0x33e   :  { %2763 = vmatpush1.bf16.msra.mxu0 %v2762_v51 }
 0x33f   :  { %2765 = vmatprep.subr.bf16.mxu0 %v2764_v52 }
 0x342   :  { %2767 = vmatpush1.bf16.msra.mxu0 %v2766_v55 }
 0x39c   :  { %v952_v58 = vpop.f32.mrb[50].mxu0 }
 0x39d   :  { %v953_v59 = vadd.f32 %v3988_v56, %v952_v58  ;;  %v2440_v60 = vpop.f32.mrb[51].mxu0 }
 0x39f   :  { %v1076_v62 = vmax.f32 %v953_v59, 0.0 }
 0x3a0   :  { %v957_v63 = vpop.f32.mrb[52].mxu0 }
 0x3a1   :  { %v958_v0 = vadd.f32 %v3988_v56, %v957_v63  ;;  %v2443_v2 = vpop.f32.mrb[53].mxu0  ;;  %2546 = vmatmul.mubr.f32.vlgmr.msra.gmra.mrb[100].mxu1 %v1076_v62 }
 0x3a2   :  { %2548 = vmatprep.mubr.msk.f32.mxu1 %vm3019_vm0, %v3020_v57  ;;  %2780 = vmatpush1.bf16.msra.mxu1 %v2742_v22 }
 0x3a3   :  { %v1077_v4 = vmax.f32 %v958_v0, 0.0  ;;  %2773 = vmatprep.subr.bf16.mxu1 %v2744_v23 }
 0x3a4   :  { %v962_v5 = vpop.f32.mrb[54].mxu0 }
 0x3a5   :  { %v963_v6 = vadd.f32 %v3988_v56, %v962_v5  ;;  %v2446_v7 = vpop.f32.mrb[55].mxu0  ;;  %2549 = vmatmul.mubr.f32.gmra.mrb[102].mxu1 %v1077_v4 }
 0x3a6   :  { %2551 = vmatprep.mubr.msk.f32.mxu1 %vm3019_vm0, %v3020_v57  ;;  %2781 = vmatpush1.bf16.msra.mxu1 %v2746_v28 }
 0x3a7   :  { %v1078_v8 = vmax.f32 %v963_v6, 0.0  ;;  %2774 = vmatprep.subr.bf16.mxu1 %v2748_v29 }
 0x3a8   :  { %v967_v3 = vpop.f32.mrb[56].mxu0 }
 0x3a9   :  { %v968_v9 = vadd.f32 %v3988_v56, %v967_v3  ;;  %v2449_v10 = vpop.f32.mrb[57].mxu0  ;;  %2552 = vmatmul.mubr.f32.gmra.mrb[104].mxu1 %v1078_v8 }
 0x3aa   :  { %2554 = vmatprep.mubr.msk.f32.mxu1 %vm3019_vm0, %v3020_v57  ;;  %2782 = vmatpush1.bf16.msra.mxu1 %v2750_v34 }
 0x3ab   :  { %v1079_v11 = vmax.f32 %v968_v9, 0.0  ;;  %2775 = vmatprep.subr.bf16.mxu1 %v2752_v35 }
 0x3ac   :  { %v972_v12 = vpop.f32.mrb[58].mxu0 }
 0x3ad   :  { %v973_v13 = vadd.f32 %v3988_v56, %v972_v12  ;;  %v2452_v14 = vpop.f32.mrb[59].mxu0  ;;  %2555 = vmatmul.mubr.f32.gmra.mrb[106].mxu1 %v1079_v11 }
 0x3ae   :  { %2557 = vmatprep.mubr.msk.f32.mxu1 %vm3019_vm0, %v3020_v57  ;;  %2783 = vmatpush1.bf16.msra.mxu1 %v2754_v40 }
 0x3af   :  { %v1080_v15 = vmax.f32 %v973_v13, 0.0  ;;  %2776 = vmatprep.subr.bf16.mxu1 %v2756_v41 }
 0x3b0   :  { %v977_v16 = vpop.f32.mrb[60].mxu0 }
 0x3b1   :  { %v978_v17 = vadd.f32 %v3988_v56, %v977_v16  ;;  %v2455_v61 = vpop.f32.mrb[61].mxu0  ;;  %2558 = vmatmul.mubr.f32.gmra.mrb[108].mxu1 %v1080_v15 }
 0x3b2   :  { %2560 = vmatprep.mubr.msk.f32.mxu1 %vm3019_vm0, %v3020_v57  ;;  %2784 = vmatpush1.bf16.msra.mxu1 %v2758_v45 }
 0x3b3   :  { %v1081_v18 = vmax.f32 %v978_v17, 0.0  ;;  %2777 = vmatprep.subr.bf16.mxu1 %v2760_v46 }
 0x3b4   :  { %v982_v19 = vpop.f32.mrb[62].mxu0 }
 0x3b5   :  { %v983_v20 = vadd.f32 %v3988_v56, %v982_v19  ;;  %v2458_v21 = vpop.f32.mrb[63].mxu0  ;;  %2561 = vmatmul.mubr.f32.gmra.mrb[110].mxu1 %v1081_v18 }
 0x3b6   :  { %2563 = vmatprep.mubr.msk.f32.mxu1 %vm3019_vm0, %v3020_v57  ;;  %2785 = vmatpush1.bf16.msra.mxu1 %v2762_v51  ;;  %v1370_v21 = vld [vmem:[%s4209_s11 + $0xf8] sm:$0xff] }
 0x3b7   :  { %v1082_v22 = vmax.f32 %v983_v20, 0.0  ;;  %2778 = vmatprep.subr.bf16.mxu1 %v2764_v52  ;;  %v1368_v20 = vld [vmem:[%s4209_s11 + $0xe8] sm:$0xff] }
 0x3b8   :  { %v987_v23 = vpop.f32.mrb[64].mxu0 }
 0x3b9   :  { %v988_v24 = vadd.f32 %v3988_v56, %v987_v23  ;;  %v2461_v25 = vpop.f32.mrb[65].mxu0  ;;  %2564 = vmatmul.mubr.f32.gmra.mrb[112].mxu1 %v1082_v22  ;;  %v2768_v23 = vpack.c.bf16 %v1370_v21, %v1368_v20 }
 0x3ba   :  { %2566 = vmatprep.mubr.msk.f32.mxu1 %vm3019_vm0, %v3020_v57  ;;  %2786 = vmatpush1.bf16.msra.mxu1 %v2766_v55  ;;  %v1369_v25 = vld [vmem:[%s4209_s11 + $0xf0] sm:$0xff] }
 0x3bb   :  { %v1083_v26 = vmax.f32 %v988_v24, 0.0  ;;  %v1367_v24 = vld [vmem:[%s4209_s11 + $0xe0] sm:$0xff]  ;;  %2769 = vmatprep.subr.bf16.mxu0 %v2768_v23  ;;  %2779 = vmatprep.subr.bf16.mxu1 %v2768_v23 }
 0x3bc   :  { %v992_v27 = vpop.f32.mrb[66].mxu0 }
 0x3bd   :  { %v993_v28 = vadd.f32 %v3988_v56, %v992_v27  ;;  %v2464_v29 = vpop.f32.mrb[67].mxu0  ;;  %2567 = vmatmul.mubr.f32.gmra.mrb[114].mxu1 %v1083_v26  ;;  %v2770_v27 = vpack.c.bf16 %v1369_v25, %v1367_v24 }
 0x3be   :  { %2569 = vmatprep.mubr.msk.f32.mxu1 %vm3019_vm0, %v3020_v57 }
 0x3bf   :  { %v1084_v30 = vmax.f32 %v993_v28, 0.0  ;;  %2771 = vmatpush1.bf16.msra.mxu0 %v2770_v27  ;;  %2787 = vmatpush1.bf16.msra.mxu1 %v2770_v27 }
 0x3c0   :  { %v997_v31 = vpop.f32.mrb[68].mxu0 }
 0x3c1   :  { %v998_v32 = vadd.f32 %v3988_v56, %v997_v31  ;;  %v2467_v33 = vpop.f32.mrb[69].mxu0  ;;  %2570 = vmatmul.mubr.f32.gmra.mrb[116].mxu1 %v1084_v30 }
 0x3c2   :  { %2572 = vmatprep.mubr.msk.f32.mxu1 %vm3019_vm0, %v3020_v57 }
 0x3c3   :  { %v1085_v34 = vmax.f32 %v998_v32, 0.0 }
 0x3c4   :  { %v1002_v35 = vpop.f32.mrb[70].mxu0 }
 0x3c5   :  { %v1003_v36 = vadd.f32 %v3988_v56, %v1002_v35  ;;  %v2470_v37 = vpop.f32.mrb[71].mxu0  ;;  %2573 = vmatmul.mubr.f32.gmra.mrb[118].mxu1 %v1085_v34 }
 0x3c6   :  { %2575 = vmatprep.mubr.msk.f32.mxu1 %vm3019_vm0, %v3020_v57 }
 0x3c7   :  { %v1086_v38 = vmax.f32 %v1003_v36, 0.0 }
 0x3c8   :  { %v1007_v39 = vpop.f32.mrb[72].mxu0 }
 0x3c9   :  { %v1008_v40 = vadd.f32 %v3988_v56, %v1007_v39  ;;  %v2473_v41 = vpop.f32.mrb[73].mxu0  ;;  %2576 = vmatmul.mubr.f32.gmra.mrb[120].mxu1 %v1086_v38  ;;  %v4079_v39 = vld [vmem:[%s4208_s10] ss:$0 sm:$0xff] }
 0x3ca   :  { %2578 = vmatprep.mubr.msk.f32.mxu1 %vm3019_vm0, %v3020_v57 }
 0x3cb   :  { %v1087_v42 = vmax.f32 %v1008_v40, 0.0 }
 0x3cc   :  { %v1012_v1 = vpop.f32.mrb[74].mxu0 }
 0x3cd   :  { %v1013_v43 = vadd.f32 %v3988_v56, %v1012_v1  ;;  %v2476_v44 = vpop.f32.mrb[75].mxu0  ;;  %2579 = vmatmul.mubr.f32.gmra.mrb[122].mxu1 %v1087_v42 }
 0x3ce   :  { %2581 = vmatprep.mubr.msk.f32.mxu1 %vm3019_vm0, %v3020_v57 }
 0x3cf   :  { %v1088_v45 = vmax.f32 %v1013_v43, 0.0 }
 0x3d0   :  { %v1017_v46 = vpop.f32.mrb[76].mxu0 }
 0x3d1   :  { %v1018_v47 = vadd.f32 %v3988_v56, %v1017_v46  ;;  %v2479_v48 = vpop.f32.mrb[77].mxu0  ;;  %2582 = vmatmul.mubr.f32.gmra.mrb[124].mxu1 %v1088_v45 }
 0x3d2   :  { %2584 = vmatprep.mubr.msk.f32.mxu1 %vm3019_vm0, %v3020_v57 }
 0x3d3   :  { %v1089_v49 = vmax.f32 %v1018_v47, 0.0 }
 0x3d4   :  { %v1022_v50 = vpop.f32.mrb[78].mxu0 }
 0x3d5   :  { %v1023_v51 = vadd.f32 %v3988_v56, %v1022_v50  ;;  %v2482_v52 = vpop.f32.mrb[79].mxu0  ;;  %2585 = vmatmul.mubr.f32.gmra.mrb[126].mxu1 %v1089_v49 }
 0x3d6   :  { %2587 = vmatprep.mubr.msk.f32.mxu1 %vm3019_vm0, %v3020_v57 }
 0x3d7   :  { %v1090_v53 = vmax.f32 %v1023_v51, 0.0 }
 0x3d8   :  { %v1027_v54 = vpop.f32.mrb[80].mxu0 }
 0x3d9   :  { %v1028_v55 = vadd.f32 %v3988_v56, %v1027_v54  ;;  %v2485_v58 = vpop.f32.mrb[81].mxu0  ;;  %2588 = vmatmul.mubr.f32.gmra.mrb[128].mxu1 %v1090_v53 }
 0x3da   :  { %2590 = vmatprep.mubr.msk.f32.mxu1 %vm3019_vm0, %v3020_v57 }
 0x3db   :  { %v1091_v59 = vmax.f32 %v1028_v55, 0.0 }
 0x3dc   :  { %v1032_v60 = vpop.f32.mrb[82].mxu0 }
 0x3dd   :  { %v1033_v62 = vadd.f32 %v3988_v56, %v1032_v60  ;;  %v2488_v63 = vpop.f32.mrb[83].mxu0  ;;  %2591 = vmatmul.mubr.f32.gmra.mrb[130].mxu1 %v1091_v59 }
 0x3de   :  { %2593 = vmatprep.mubr.msk.f32.mxu1 %vm3019_vm0, %v3020_v57 }
 0x3df   :  { %v1092_v0 = vmax.f32 %v1033_v62, 0.0 }
 0x3e0   :  { %v1037_v2 = vpop.f32.mrb[84].mxu0 }
 0x3e1   :  { %v1038_v4 = vadd.f32 %v3988_v56, %v1037_v2  ;;  %v2491_v5 = vpop.f32.mrb[85].mxu0  ;;  %2594 = vmatmul.mubr.f32.gmra.mrb[132].mxu1 %v1092_v0 }
 0x3e2   :  { %2596 = vmatprep.mubr.msk.f32.mxu1 %vm3019_vm0, %v3020_v57 }
 0x3e3   :  { %v1093_v6 = vmax.f32 %v1038_v4, 0.0 }
 0x3e4   :  { %v1042_v7 = vpop.f32.mrb[86].mxu0 }
 0x3e5   :  { %v1043_v8 = vadd.f32 %v3988_v56, %v1042_v7  ;;  %v2494_v3 = vpop.f32.mrb[87].mxu0  ;;  %2597 = vmatmul.mubr.f32.gmra.mrb[134].mxu1 %v1093_v6 }
 0x3e6   :  { %2599 = vmatprep.mubr.msk.f32.mxu1 %vm3019_vm0, %v3020_v57 }
 0x3e7   :  { %v1094_v9 = vmax.f32 %v1043_v8, 0.0 }
 0x3e8   :  { %v1047_v10 = vpop.f32.mrb[88].mxu0 }
 0x3e9   :  { %v1048_v11 = vadd.f32 %v3988_v56, %v1047_v10  ;;  %v2497_v12 = vpop.f32.mrb[89].mxu0  ;;  %2600 = vmatmul.mubr.f32.gmra.mrb[136].mxu1 %v1094_v9 }
 0x3ea   :  { %2602 = vmatprep.mubr.msk.f32.mxu1 %vm3019_vm0, %v3020_v57 }
 0x3eb   :  { %v1095_v13 = vmax.f32 %v1048_v11, 0.0 }
 0x3ec   :  { %v1052_v14 = vpop.f32.mrb[90].mxu0 }
 0x3ed   :  { %v1053_v15 = vadd.f32 %v3988_v56, %v1052_v14  ;;  %v2500_v16 = vpop.f32.mrb[91].mxu0  ;;  %2603 = vmatmul.mubr.f32.gmra.mrb[138].mxu1 %v1095_v13 }
 0x3ee   :  { %2605 = vmatprep.mubr.msk.f32.mxu1 %vm3019_vm0, %v3020_v57 }
 0x3ef   :  { %v1096_v17 = vmax.f32 %v1053_v15, 0.0 }
 0x3f0   :  { %v1057_v61 = vpop.f32.mrb[92].mxu0 }
 0x3f1   :  { %v1058_v18 = vadd.f32 %v3988_v56, %v1057_v61  ;;  %v2503_v19 = vpop.f32.mrb[93].mxu0  ;;  %2606 = vmatmul.mubr.f32.gmra.mrb[140].mxu1 %v1096_v17 }
 0x3f2   :  { %2608 = vmatprep.mubr.msk.f32.mxu1 %vm3019_vm0, %v3020_v57 }
 0x3f3   :  { %v1097_v22 = vmax.f32 %v1058_v18, 0.0 }
 0x3f4   :  { %v1062_v26 = vpop.f32.mrb[94].mxu0 }
 0x3f5   :  { %v1063_v28 = vadd.f32 %v3988_v56, %v1062_v26  ;;  %v2506_v29 = vpop.f32.mrb[95].mxu0  ;;  %2609 = vmatmul.mubr.f32.gmra.mrb[142].mxu1 %v1097_v22 }
 0x3f6   :  { %2611 = vmatprep.mubr.msk.f32.mxu1 %vm3019_vm0, %v3020_v57 }
 0x3f7   :  { %v1098_v30 = vmax.f32 %v1063_v28, 0.0 }
 0x3f8   :  { %v1067_v31 = vpop.f32.mrb[96].mxu0 }
 0x3f9   :  { %v1068_v32 = vadd.f32 %v3988_v56, %v1067_v31  ;;  %v2509_v33 = vpop.f32.mrb[97].mxu0  ;;  %2612 = vmatmul.mubr.f32.gmra.mrb[144].mxu1 %v1098_v30 }
 0x3fa   :  { %2614 = vmatprep.mubr.msk.f32.mxu1 %vm3019_vm0, %v3020_v57 }
 0x3fb   :  { %v1099_v34 = vmax.f32 %v1068_v32, 0.0 }
 0x3fc   :  { %v1072_v35 = vpop.f32.mrb[98].mxu0 }
 0x3fd   :  { %v1073_v36 = vadd.f32 %v3988_v56, %v1072_v35  ;;  %v2512_v37 = vpop.f32.mrb[99].mxu0  ;;  %2615 = vmatmul.mubr.f32.gmra.mrb[146].mxu1 %v1099_v34 }
 0x3fe   :  { %2617 = vmatprep.mubr.msk.f32.mxu1 %vm3019_vm0, %v3020_v57 }
 0x3ff   :  { %v1100_v38 = vmax.f32 %v1073_v36, 0.0 }
 0x401   :  { %2618 = vmatmul.mubr.f32.gmra.mrb[148].mxu1 %v1100_v38 }
 0x402   :  { %1573 = vmatprep.mubr.f32.mxu1 %v3020_v57 }
 0x474   :  { %v1190_v40 = vpop.f32.mrb[100].mxu1 }
 0x475   :  { %v1191_v41 = vadd.f32 %v4079_v39, %v1190_v40  ;;  %v2547_v42 = vpop.f32.mrb[101].mxu1 }
 0x477   :  { %v1314_v1 = vmax.f32 %v1191_v41, 0.0 }
 0x478   :  { %v1195_v56 = vpop.f32.mrb[102].mxu1 }
 0x479   :  { %v1196_v43 = vadd.f32 %v4079_v39, %v1195_v56  ;;  %v2550_v44 = vpop.f32.mrb[103].mxu1  ;;  %1448 = vmatmul.mubr.f32.vlgmr.msra.gmra.mrb[100].mxu0 %v1314_v1 }
 0x47a   :  { %1453 = vmatprep.mubr.f32.mxu0 %v3020_v57 }
 0x47b   :  { %v1315_v45 = vmax.f32 %v1196_v43, 0.0 }
 0x47c   :  { %v1200_v46 = vpop.f32.mrb[104].mxu1 }
 0x47d   :  { %v1201_v47 = vadd.f32 %v4079_v39, %v1200_v46  ;;  %v2553_v48 = vpop.f32.mrb[105].mxu1  ;;  %1454 = vmatmul.mubr.f32.gmra.mrb[102].mxu0 %v1315_v45 }
 0x47e   :  { %1459 = vmatprep.mubr.f32.mxu0 %v3020_v57 }
 0x47f   :  { %v1316_v49 = vmax.f32 %v1201_v47, 0.0 }
 0x480   :  { %v1205_v50 = vpop.f32.mrb[106].mxu1 }
 0x481   :  { %v1206_v51 = vadd.f32 %v4079_v39, %v1205_v50  ;;  %v2556_v52 = vpop.f32.mrb[107].mxu1  ;;  %1460 = vmatmul.mubr.f32.gmra.mrb[104].mxu0 %v1316_v49 }
 0x482   :  { %1465 = vmatprep.mubr.f32.mxu0 %v3020_v57 }
 0x483   :  { %v1317_v53 = vmax.f32 %v1206_v51, 0.0 }
 0x484   :  { %v1210_v54 = vpop.f32.mrb[108].mxu1 }
 0x485   :  { %v1211_v55 = vadd.f32 %v4079_v39, %v1210_v54  ;;  %v2559_v58 = vpop.f32.mrb[109].mxu1  ;;  %1466 = vmatmul.mubr.f32.gmra.mrb[106].mxu0 %v1317_v53 }
 0x486   :  { %1471 = vmatprep.mubr.f32.mxu0 %v3020_v57 }
 0x487   :  { %v1318_v59 = vmax.f32 %v1211_v55, 0.0 }
 0x488   :  { %v1215_v60 = vpop.f32.mrb[110].mxu1 }
 0x489   :  { %v1216_v62 = vadd.f32 %v4079_v39, %v1215_v60  ;;  %v2562_v63 = vpop.f32.mrb[111].mxu1  ;;  %1472 = vmatmul.mubr.f32.gmra.mrb[108].mxu0 %v1318_v59 }
 0x48a   :  { %1477 = vmatprep.mubr.f32.mxu0 %v3020_v57 }
 0x48b   :  { %v1319_v0 = vmax.f32 %v1216_v62, 0.0 }
 0x48c   :  { %v1220_v2 = vpop.f32.mrb[112].mxu1 }
 0x48d   :  { %v1221_v4 = vadd.f32 %v4079_v39, %v1220_v2  ;;  %v2565_v5 = vpop.f32.mrb[113].mxu1  ;;  %1478 = vmatmul.mubr.f32.gmra.mrb[110].mxu0 %v1319_v0 }
 0x48e   :  { %1483 = vmatprep.mubr.f32.mxu0 %v3020_v57 }
 0x48f   :  { %v1320_v6 = vmax.f32 %v1221_v4, 0.0 }
 0x490   :  { %v1225_v7 = vpop.f32.mrb[114].mxu1 }
 0x491   :  { %v1226_v8 = vadd.f32 %v4079_v39, %v1225_v7  ;;  %v2568_v3 = vpop.f32.mrb[115].mxu1  ;;  %1484 = vmatmul.mubr.f32.gmra.mrb[112].mxu0 %v1320_v6 }
 0x492   :  { %1489 = vmatprep.mubr.f32.mxu0 %v3020_v57 }
 0x493   :  { %v1321_v9 = vmax.f32 %v1226_v8, 0.0 }
 0x494   :  { %v1230_v10 = vpop.f32.mrb[116].mxu1 }
 0x495   :  { %v1231_v11 = vadd.f32 %v4079_v39, %v1230_v10  ;;  %v2571_v12 = vpop.f32.mrb[117].mxu1  ;;  %1490 = vmatmul.mubr.f32.gmra.mrb[114].mxu0 %v1321_v9 }
 0x496   :  { %1495 = vmatprep.mubr.f32.mxu0 %v3020_v57 }
 0x497   :  { %v1322_v13 = vmax.f32 %v1231_v11, 0.0 }
 0x498   :  { %v1235_v14 = vpop.f32.mrb[118].mxu1 }
 0x499   :  { %v1236_v15 = vadd.f32 %v4079_v39, %v1235_v14  ;;  %v2574_v16 = vpop.f32.mrb[119].mxu1  ;;  %1496 = vmatmul.mubr.f32.gmra.mrb[116].mxu0 %v1322_v13 }
 0x49a   :  { %1501 = vmatprep.mubr.f32.mxu0 %v3020_v57  ;;  %v1373_v16 = vlaneseq }
 0x49b   :  { %v1323_v17 = vmax.f32 %v1236_v15, 0.0 }
 0x49c   :  { %v1240_v61 = vpop.f32.mrb[120].mxu1 }
 0x49d   :  { %v1241_v18 = vadd.f32 %v4079_v39, %v1240_v61  ;;  %v2577_v19 = vpop.f32.mrb[121].mxu1  ;;  %1502 = vmatmul.mubr.f32.gmra.mrb[118].mxu0 %v1323_v17  ;;  %v1374_v17 = vshrl.u32 %v1373_v16, 7 }
 0x49e   :  { %1507 = vmatprep.mubr.f32.mxu0 %v3020_v57 }
 0x49f   :  { %v1324_v20 = vmax.f32 %v1241_v18, 0.0  ;;  %v1375_v61 = vsub.s32 0, %v1374_v17  ;;  %v1371_v18 = vld [vmem:[%s4210_s12] sm:$0x3]  ;;  %v1379_v19 = vsub.s32 1, %v1374_v17  ;;  %s3021_s12 = smov [#allocation2]  }
 0x4a0   :  { %v1245_v21 = vpop.f32.mrb[122].mxu1  ;;  %s1978_s4 = sshll.u32 %s3021_s12, 4  ;;  %s1979_s4 = int_to_ptr.vmem [resolvable:$true] %s1978_s4 }
 0x4a1   :  { %v1246_v22 = vadd.f32 %v4079_v39, %v1245_v21  ;;  %v2580_v23 = vpop.f32.mrb[123].mxu1  ;;  %1508 = vmatmul.mubr.f32.gmra.mrb[120].mxu0 %v1324_v20  ;;  %v4132_v20 = vrot.slane %v1371_v18, %v1375_v61  ;;  %v4134_v21 = vrot.slane %v1371_v18, %v1379_v19  ;;  %s2994_s7 = scalar_lea.vmem %s1979_s4, 6400  ;;  %p2999_p1 = scmp.lt.s32.totalorder %s1979_s4, %s1979_s4 }
 0x4a2   :  { %1513 = vmatprep.mubr.f32.mxu0 %v3020_v57  ;;  %p2995_p0 = scmp.ne.s32.totalorder %s1979_s4, %s2994_s7  ;;  %p3000_p2 = scmp.lt.s32.totalorder %s2994_s7, %s2994_s7 }
 0x4a3   :  { %v1325_v24 = vmax.f32 %v1246_v22, 0.0 }
 0x4a4   :  { %v1250_v25 = vpop.f32.mrb[124].mxu1  ;;  %p3001_p3 = por %p3000_p2, %p2999_p1 }
 0x4a5   :  { %v1251_v26 = vadd.f32 %v4079_v39, %v1250_v25  ;;  %v2583_v27 = vpop.f32.mrb[125].mxu1  ;;  %1514 = vmatmul.mubr.f32.gmra.mrb[122].mxu0 %v1325_v24 }
 0x4a6   :  { %1519 = vmatprep.mubr.f32.mxu0 %v3020_v57  ;;  %p3002_p4 = pnand %p3001_p3, %p2995_p0 }
 0x4a7   :  { %v1326_v28 = vmax.f32 %v1251_v26, 0.0 }
 0x4a8   :  { %v1255_v29 = vpop.f32.mrb[126].mxu1 }
 0x4a9   :  { %v1256_v30 = vadd.f32 %v4079_v39, %v1255_v29  ;;  %v2586_v31 = vpop.f32.mrb[127].mxu1  ;;  %1520 = vmatmul.mubr.f32.gmra.mrb[124].mxu0 %v1326_v28 }
 0x4aa   :  { %1525 = vmatprep.mubr.f32.mxu0 %v3020_v57 }
 0x4ab   :  { %v1327_v32 = vmax.f32 %v1256_v30, 0.0 }
 0x4ac   :  { %v1260_v33 = vpop.f32.mrb[128].mxu1 }
 0x4ad   :  { %v1261_v34 = vadd.f32 %v4079_v39, %v1260_v33  ;;  %v2589_v35 = vpop.f32.mrb[129].mxu1  ;;  %1526 = vmatmul.mubr.f32.gmra.mrb[126].mxu0 %v1327_v32 }
 0x4ae   :  { %1531 = vmatprep.mubr.f32.mxu0 %v3020_v57 }
 0x4af   :  { %v1328_v36 = vmax.f32 %v1261_v34, 0.0 }
 0x4b0   :  { %v1265_v37 = vpop.f32.mrb[130].mxu1 }
 0x4b1   :  { %v1266_v38 = vadd.f32 %v4079_v39, %v1265_v37  ;;  %v2592_v40 = vpop.f32.mrb[131].mxu1  ;;  %1532 = vmatmul.mubr.f32.gmra.mrb[128].mxu0 %v1328_v36 }
 0x4b2   :  { %1537 = vmatprep.mubr.f32.mxu0 %v3020_v57 }
 0x4b3   :  { %v1329_v41 = vmax.f32 %v1266_v38, 0.0 }
 0x4b4   :  { %v1270_v42 = vpop.f32.mrb[132].mxu1 }
 0x4b5   :  { %v1271_v1 = vadd.f32 %v4079_v39, %v1270_v42  ;;  %v2595_v56 = vpop.f32.mrb[133].mxu1  ;;  %1538 = vmatmul.mubr.f32.gmra.mrb[130].mxu0 %v1329_v41 }
 0x4b6   :  { %1543 = vmatprep.mubr.f32.mxu0 %v3020_v57 }
 0x4b7   :  { %v1330_v43 = vmax.f32 %v1271_v1, 0.0 }
 0x4b8   :  { %v1275_v44 = vpop.f32.mrb[134].mxu1 }
 0x4b9   :  { %v1276_v45 = vadd.f32 %v4079_v39, %v1275_v44  ;;  %v2598_v46 = vpop.f32.mrb[135].mxu1  ;;  %1544 = vmatmul.mubr.f32.gmra.mrb[132].mxu0 %v1330_v43 }
 0x4ba   :  { %1549 = vmatprep.mubr.f32.mxu0 %v3020_v57 }
 0x4bb   :  { %v1331_v47 = vmax.f32 %v1276_v45, 0.0 }
 0x4bc   :  { %v1280_v48 = vpop.f32.mrb[136].mxu1 }
 0x4bd   :  { %v1281_v49 = vadd.f32 %v4079_v39, %v1280_v48  ;;  %v2601_v50 = vpop.f32.mrb[137].mxu1  ;;  %1550 = vmatmul.mubr.f32.gmra.mrb[134].mxu0 %v1331_v47 }
 0x4be   :  { %1555 = vmatprep.mubr.f32.mxu0 %v3020_v57 }
 0x4bf   :  { %v1332_v51 = vmax.f32 %v1281_v49, 0.0 }
 0x4c0   :  { %v1285_v52 = vpop.f32.mrb[138].mxu1 }
 0x4c1   :  { %v1286_v53 = vadd.f32 %v4079_v39, %v1285_v52  ;;  %v2604_v54 = vpop.f32.mrb[139].mxu1  ;;  %1556 = vmatmul.mubr.f32.gmra.mrb[136].mxu0 %v1332_v51 }
 0x4c2   :  { %1561 = vmatprep.mubr.f32.mxu0 %v3020_v57 }
 0x4c3   :  { %v1333_v55 = vmax.f32 %v1286_v53, 0.0 }
 0x4c4   :  { %v1290_v58 = vpop.f32.mrb[140].mxu1 }
 0x4c5   :  { %v1291_v59 = vadd.f32 %v4079_v39, %v1290_v58  ;;  %v2607_v60 = vpop.f32.mrb[141].mxu1  ;;  %1562 = vmatmul.mubr.f32.gmra.mrb[138].mxu0 %v1333_v55 }
 0x4c6   :  { %1567 = vmatprep.mubr.f32.mxu0 %v3020_v57 }
 0x4c7   :  { %v1334_v62 = vmax.f32 %v1291_v59, 0.0 }
 0x4c8   :  { %v1295_v63 = vpop.f32.mrb[142].mxu1 }
 0x4c9   :  { %v1296_v0 = vadd.f32 %v4079_v39, %v1295_v63  ;;  %v2610_v2 = vpop.f32.mrb[143].mxu1  ;;  %1568 = vmatmul.mubr.f32.gmra.mrb[140].mxu0 %v1334_v62 }
 0x4cb   :  { %v1335_v4 = vmax.f32 %v1296_v0, 0.0 }
 0x4cc   :  { %v1300_v5 = vpop.f32.mrb[144].mxu1 }
 0x4cd   :  { %v1301_v6 = vadd.f32 %v4079_v39, %v1300_v5  ;;  %v2613_v7 = vpop.f32.mrb[145].mxu1  ;;  %1574 = vmatmul.mubr.f32.vlgmr.msra.gmra.mrb[150].mxu1 %v1335_v4 }
 0x4ce   :  { %1579 = vmatprep.mubr.f32.mxu1 %v3020_v57 }
 0x4cf   :  { %v1336_v8 = vmax.f32 %v1301_v6, 0.0 }
 0x4d0   :  { %v1305_v3 = vpop.f32.mrb[146].mxu1 }
 0x4d1   :  { %v1306_v9 = vadd.f32 %v4079_v39, %v1305_v3  ;;  %v2616_v10 = vpop.f32.mrb[147].mxu1  ;;  %1580 = vmatmul.mubr.f32.gmra.mrb[152].mxu1 %v1336_v8 }
 0x4d2   :  { %1585 = vmatprep.mubr.f32.mxu1 %v3020_v57 }
 0x4d3   :  { %v1337_v11 = vmax.f32 %v1306_v9, 0.0 }
 0x4d4   :  { %v1310_v12 = vpop.f32.mrb[148].mxu1 }
 0x4d5   :  { %v1311_v13 = vadd.f32 %v4079_v39, %v1310_v12  ;;  %v2619_v14 = vpop.f32.mrb[149].mxu1  ;;  %1586 = vmatmul.mubr.f32.gmra.mrb[154].mxu1 %v1337_v11 }
 0x4d6   :  { %1591 = vmatprep.mubr.f32.mxu1 %v3020_v57 }
 0x4d7   :  { %v1338_v15 = vmax.f32 %v1311_v13, 0.0 }
 0x4d9   :  { %1592 = vmatmul.mubr.f32.gmra.mrb[156].mxu1 %v1338_v15 }
 0x54c   :  { %v1449_v22 = vpop.f32.mrb[100].mxu0 }
 0x54d   :  { %v1450_v39 = vadd.f32 %v1449_v22, %v4132_v20  ;;  %v1451_v23 = vpop.f32.mrb[101].mxu0 }
 0x54e   :  { %v1452_v57 = vadd.f32 %v1451_v23, %v4134_v21 }
 0x54f   :  { %v2023_v24 = vmul.f32 -1.442695, %v1450_v39 }
 0x550   :  { %v2024_v25 = vmul.f32 -1.442695, %v1452_v57  ;;  %v1455_v26 = vpop.f32.mrb[102].mxu0 }
 0x551   :  { %2794 = vpow2.f32 %v2023_v24  ;;  %v1456_v27 = vadd.f32 %v1455_v26, %v4132_v20  ;;  %v1457_v28 = vpop.f32.mrb[103].mxu0 }
 0x552   :  { %2796 = vpow2.f32 %v2024_v25  ;;  %v1458_v29 = vadd.f32 %v1457_v28, %v4134_v21 }
 0x553   :  { %v2025_v30 = vmul.f32 -1.442695, %v1456_v27 }
 0x554   :  { %v2026_v31 = vmul.f32 -1.442695, %v1458_v29  ;;  %v1461_v32 = vpop.f32.mrb[104].mxu0 }
 0x555   :  { %2798 = vpow2.f32 %v2025_v30  ;;  %v1462_v33 = vadd.f32 %v1461_v32, %v4132_v20  ;;  %v1463_v34 = vpop.f32.mrb[105].mxu0 }
 0x556   :  { %2800 = vpow2.f32 %v2026_v31  ;;  %v1464_v35 = vadd.f32 %v1463_v34, %v4134_v21 }
 0x557   :  { %v2027_v36 = vmul.f32 -1.442695, %v1462_v33 }
 0x558   :  { %v2028_v37 = vmul.f32 -1.442695, %v1464_v35  ;;  %v1467_v38 = vpop.f32.mrb[106].mxu0 }
 0x559   :  { %2802 = vpow2.f32 %v2027_v36  ;;  %v1468_v40 = vadd.f32 %v1467_v38, %v4132_v20  ;;  %v1469_v41 = vpop.f32.mrb[107].mxu0 }
 0x55a   :  { %2804 = vpow2.f32 %v2028_v37  ;;  %v1470_v42 = vadd.f32 %v1469_v41, %v4134_v21 }
 0x55b   :  { %v2795_v1 = vpop.eup %2794  ;;  %v2029_v56 = vmul.f32 -1.442695, %v1468_v40 }
 0x55c   :  { %v2797_v43 = vpop.eup %2796  ;;  %v1748_v44 = vadd.f32 1.0, %v2795_v1  ;;  %v2030_v45 = vmul.f32 -1.442695, %v1470_v42  ;;  %v1473_v46 = vpop.f32.mrb[108].mxu0 }
 0x55d   :  { %v1749_v47 = vadd.f32 1.0, %v2797_v43  ;;  %2806 = vpow2.f32 %v2029_v56  ;;  %v1474_v48 = vadd.f32 %v1473_v46, %v4132_v20  ;;  %v1475_v49 = vpop.f32.mrb[109].mxu0 }
 0x55e   :  { %2808 = vrcp.f32 %v1748_v44  ;;  %v1476_v50 = vadd.f32 %v1475_v49, %v4134_v21 }
 0x55f   :  { %v2799_v51 = vpop.eup %2798  ;;  %2810 = vrcp.f32 %v1749_v47  ;;  %v2031_v52 = vmul.f32 -1.442695, %v1474_v48 }
 0x560   :  { %v2801_v53 = vpop.eup %2800  ;;  %v1750_v54 = vadd.f32 1.0, %v2799_v51  ;;  %2812 = vpow2.f32 %v2030_v45  ;;  %v2032_v55 = vmul.f32 -1.442695, %v1476_v50  ;;  %v1479_v58 = vpop.f32.mrb[110].mxu0 }
 0x561   :  { %v1751_v59 = vadd.f32 1.0, %v2801_v53  ;;  %2814 = vpow2.f32 %v2031_v52  ;;  %v1480_v60 = vadd.f32 %v1479_v58, %v4132_v20  ;;  %v1481_v62 = vpop.f32.mrb[111].mxu0 }
 0x562   :  { %2816 = vrcp.f32 %v1750_v54  ;;  %v1482_v63 = vadd.f32 %v1481_v62, %v4134_v21 }
 0x563   :  { %v2803_v0 = vpop.eup %2802  ;;  %2818 = vrcp.f32 %v1751_v59  ;;  %v2033_v2 = vmul.f32 -1.442695, %v1480_v60 }
 0x564   :  { %v2805_v4 = vpop.eup %2804  ;;  %v1752_v5 = vadd.f32 1.0, %v2803_v0  ;;  %2820 = vpow2.f32 %v2032_v55  ;;  %v2034_v6 = vmul.f32 -1.442695, %v1482_v63  ;;  %v1485_v7 = vpop.f32.mrb[112].mxu0 }
 0x565   :  { %v1753_v8 = vadd.f32 1.0, %v2805_v4  ;;  %2822 = vpow2.f32 %v2033_v2  ;;  %v1486_v3 = vadd.f32 %v1485_v7, %v4132_v20  ;;  %v1487_v9 = vpop.f32.mrb[113].mxu0 }
 0x566   :  { %2824 = vrcp.f32 %v1752_v5  ;;  %v1488_v10 = vadd.f32 %v1487_v9, %v4134_v21 }
 0x567   :  { %v2807_v11 = vpop.eup %2806  ;;  %2826 = vrcp.f32 %v1753_v8  ;;  %v2035_v12 = vmul.f32 -1.442695, %v1486_v3 }
 0x568   :  { %v2809_v13 = vpop.eup %2808  ;;  %v1754_v14 = vadd.f32 1.0, %v2807_v11  ;;  %2828 = vpow2.f32 %v2034_v6  ;;  %v2036_v15 = vmul.f32 -1.442695, %v1488_v10  ;;  %v1491_v16 = vpop.f32.mrb[114].mxu0 }
 0x569   :  { %v2811_v17 = vpop.eup %2810  ;;  %1898 = vst [vmem:[#allocation2] sm:$0xff] %v2809_v13  ;;  %2830 = vpow2.f32 %v2035_v12  ;;  %v1492_v61 = vadd.f32 %v1491_v16, %v4132_v20  ;;  %v1493_v18 = vpop.f32.mrb[115].mxu0 }
 0x56a   :  { %v2813_v19 = vpop.eup %2812  ;;  %1899 = vst [vmem:[#allocation2 + $0x8] sm:$0xff] %v2811_v17  ;;  %2832 = vrcp.f32 %v1754_v14  ;;  %v1494_v22 = vadd.f32 %v1493_v18, %v4134_v21 }
 0x56b   :  { %v2815_v39 = vpop.eup %2814  ;;  %v1755_v23 = vadd.f32 1.0, %v2813_v19  ;;  %2834 = vpow2.f32 %v2036_v15  ;;  %v2037_v57 = vmul.f32 -1.442695, %v1492_v61 }
 0x56c   :  { %v2817_v24 = vpop.eup %2816  ;;  %v1756_v25 = vadd.f32 1.0, %v2815_v39  ;;  %v2038_v26 = vmul.f32 -1.442695, %v1494_v22  ;;  %v1497_v27 = vpop.f32.mrb[116].mxu0 }
 0x56d   :  { %v2819_v28 = vpop.eup %2818  ;;  %1900 = vst [vmem:[#allocation2 + $0x10] sm:$0xff] %v2817_v24  ;;  %2836 = vrcp.f32 %v1755_v23  ;;  %v1498_v29 = vadd.f32 %v1497_v27, %v4132_v20  ;;  %v1499_v30 = vpop.f32.mrb[117].mxu0 }
 0x56e   :  { %v2821_v31 = vpop.eup %2820  ;;  %1901 = vst [vmem:[#allocation2 + $0x18] sm:$0xff] %v2819_v28  ;;  %2838 = vrcp.f32 %v1756_v25  ;;  %v1500_v32 = vadd.f32 %v1499_v30, %v4134_v21 }
 0x56f   :  { %v2823_v33 = vpop.eup %2822  ;;  %v1757_v34 = vadd.f32 1.0, %v2821_v31  ;;  %2840 = vpow2.f32 %v2037_v57  ;;  %v2039_v35 = vmul.f32 -1.442695, %v1498_v29 }
 0x570   :  { %v2825_v36 = vpop.eup %2824  ;;  %v1758_v37 = vadd.f32 1.0, %v2823_v33  ;;  %2842 = vpow2.f32 %v2038_v26  ;;  %v2040_v38 = vmul.f32 -1.442695, %v1500_v32  ;;  %v1503_v40 = vpop.f32.mrb[118].mxu0 }
 0x571   :  { %v2827_v41 = vpop.eup %2826  ;;  %1902 = vst [vmem:[#allocation2 + $0x20] sm:$0xff] %v2825_v36  ;;  %2844 = vrcp.f32 %v1757_v34  ;;  %v1504_v42 = vadd.f32 %v1503_v40, %v4132_v20  ;;  %v1505_v1 = vpop.f32.mrb[119].mxu0 }
 0x572   :  { %v2829_v56 = vpop.eup %2828  ;;  %1903 = vst [vmem:[#allocation2 + $0x28] sm:$0xff] %v2827_v41  ;;  %2846 = vrcp.f32 %v1758_v37  ;;  %v1506_v43 = vadd.f32 %v1505_v1, %v4134_v21 }
 0x573   :  { %v2831_v44 = vpop.eup %2830  ;;  %v1759_v45 = vadd.f32 1.0, %v2829_v56  ;;  %2848 = vpow2.f32 %v2039_v35  ;;  %v2041_v46 = vmul.f32 -1.442695, %v1504_v42 }
 0x574   :  { %v2833_v47 = vpop.eup %2832  ;;  %v1760_v48 = vadd.f32 1.0, %v2831_v44  ;;  %2850 = vpow2.f32 %v2040_v38  ;;  %v1509_v49 = vpop.f32.mrb[120].mxu0  ;;  %v2042_v51 = vmul.f32 -1.442695, %v1506_v43 }
 0x575   :  { %v2835_v50 = vpop.eup %2834  ;;  %1904 = vst [vmem:[#allocation2 + $0x30] sm:$0xff] %v2833_v47  ;;  %2852 = vrcp.f32 %v1759_v45  ;;  %v1510_v52 = vadd.f32 %v1509_v49, %v4132_v20  ;;  %v1511_v53 = vpop.f32.mrb[121].mxu0 }
 0x576   :  { %2854 = vrcp.f32 %v1760_v48  ;;  %v1761_v54 = vadd.f32 1.0, %v2835_v50  ;;  %v1512_v55 = vadd.f32 %v1511_v53, %v4134_v21 }
 0x577   :  { %v2837_v58 = vpop.eup %2836  ;;  %2856 = vpow2.f32 %v2041_v46  ;;  %v2043_v59 = vmul.f32 -1.442695, %v1510_v52 }
 0x578   :  { %v2839_v60 = vpop.eup %2838  ;;  %1905 = vst [vmem:[#allocation2 + $0x38] sm:$0xff] %v2837_v58  ;;  %2858 = vrcp.f32 %v1761_v54  ;;  %v2044_v62 = vmul.f32 -1.442695, %v1512_v55  ;;  %v1515_v63 = vpop.f32.mrb[122].mxu0 }
 0x579   :  { %v2841_v0 = vpop.eup %2840  ;;  %1906 = vst [vmem:[#allocation2 + $0x40] sm:$0xff] %v2839_v60  ;;  %2860 = vpow2.f32 %v2042_v51  ;;  %v1516_v2 = vadd.f32 %v1515_v63, %v4132_v20  ;;  %v1517_v4 = vpop.f32.mrb[123].mxu0 }
 0x57a   :  { %v2843_v5 = vpop.eup %2842  ;;  %v1762_v6 = vadd.f32 1.0, %v2841_v0  ;;  %2862 = vpow2.f32 %v2043_v59  ;;  %v1518_v7 = vadd.f32 %v1517_v4, %v4134_v21 }
 0x57b   :  { %v2845_v8 = vpop.eup %2844  ;;  %v1763_v3 = vadd.f32 1.0, %v2843_v5  ;;  %2864 = vpow2.f32 %v2044_v62  ;;  %v2045_v9 = vmul.f32 -1.442695, %v1516_v2 }
 0x57c   :  { %v2847_v10 = vpop.eup %2846  ;;  %1907 = vst [vmem:[#allocation2 + $0x48] sm:$0xff] %v2845_v8  ;;  %2866 = vrcp.f32 %v1762_v6  ;;  %v2046_v11 = vmul.f32 -1.442695, %v1518_v7  ;;  %v1521_v12 = vpop.f32.mrb[124].mxu0 }
 0x57d   :  { %v2849_v13 = vpop.eup %2848  ;;  %1908 = vst [vmem:[#allocation2 + $0x50] sm:$0xff] %v2847_v10  ;;  %2868 = vrcp.f32 %v1763_v3  ;;  %v1522_v14 = vadd.f32 %v1521_v12, %v4132_v20  ;;  %v1523_v15 = vpop.f32.mrb[125].mxu0 }
 0x57e   :  { %v2851_v16 = vpop.eup %2850  ;;  %v1764_v17 = vadd.f32 1.0, %v2849_v13  ;;  %2870 = vpow2.f32 %v2045_v9  ;;  %v1524_v61 = vadd.f32 %v1523_v15, %v4134_v21 }
 0x57f   :  { %v2853_v18 = vpop.eup %2852  ;;  %v1765_v19 = vadd.f32 1.0, %v2851_v16  ;;  %2872 = vpow2.f32 %v2046_v11  ;;  %v2047_v22 = vmul.f32 -1.442695, %v1522_v14 }
 0x580   :  { %v2855_v39 = vpop.eup %2854  ;;  %1909 = vst [vmem:[#allocation2 + $0x58] sm:$0xff] %v2853_v18  ;;  %2874 = vrcp.f32 %v1764_v17  ;;  %v2048_v23 = vmul.f32 -1.442695, %v1524_v61  ;;  %v1527_v57 = vpop.f32.mrb[126].mxu0 }
 0x581   :  { %v2857_v24 = vpop.eup %2856  ;;  %1910 = vst [vmem:[#allocation2 + $0x60] sm:$0xff] %v2855_v39  ;;  %2876 = vrcp.f32 %v1765_v19  ;;  %v1528_v25 = vadd.f32 %v1527_v57, %v4132_v20  ;;  %v1529_v26 = vpop.f32.mrb[127].mxu0 }
 0x582   :  { %v2859_v27 = vpop.eup %2858  ;;  %v1766_v28 = vadd.f32 1.0, %v2857_v24  ;;  %2878 = vpow2.f32 %v2047_v22  ;;  %v1530_v29 = vadd.f32 %v1529_v26, %v4134_v21 }
 0x583   :  { %v2861_v30 = vpop.eup %2860  ;;  %1911 = vst [vmem:[#allocation2 + $0x68] sm:$0xff] %v2859_v27  ;;  %2880 = vpow2.f32 %v2048_v23  ;;  %v2049_v31 = vmul.f32 -1.442695, %v1528_v25 }
 0x584   :  { %v2863_v32 = vpop.eup %2862  ;;  %2882 = vrcp.f32 %v1766_v28  ;;  %v1767_v33 = vadd.f32 1.0, %v2861_v30  ;;  %v1533_v34 = vpop.f32.mrb[128].mxu0  ;;  %v2050_v37 = vmul.f32 -1.442695, %v1530_v29 }
 0x585   :  { %v2865_v35 = vpop.eup %2864  ;;  %v1768_v36 = vadd.f32 1.0, %v2863_v32  ;;  %2884 = vpow2.f32 %v2049_v31  ;;  %v1534_v38 = vadd.f32 %v1533_v34, %v4132_v20  ;;  %v1535_v40 = vpop.f32.mrb[129].mxu0 }
 0x586   :  { %v2867_v41 = vpop.eup %2866  ;;  %2886 = vrcp.f32 %v1767_v33  ;;  %v1769_v42 = vadd.f32 1.0, %v2865_v35  ;;  %v1536_v1 = vadd.f32 %v1535_v40, %v4134_v21 }
 0x587   :  { %v2869_v56 = vpop.eup %2868  ;;  %1912 = vst [vmem:[#allocation2 + $0x70] sm:$0xff] %v2867_v41  ;;  %2888 = vrcp.f32 %v1768_v36  ;;  %v2051_v43 = vmul.f32 -1.442695, %v1534_v38 }
 0x588   :  { %v2871_v44 = vpop.eup %2870  ;;  %1913 = vst [vmem:[#allocation2 + $0x78] sm:$0xff] %v2869_v56  ;;  %2890 = vrcp.f32 %v1769_v42  ;;  %v1539_v45 = vpop.f32.mrb[130].mxu0  ;;  %v2052_v48 = vmul.f32 -1.442695, %v1536_v1 }
 0x589   :  { %v2873_v46 = vpop.eup %2872  ;;  %v1770_v47 = vadd.f32 1.0, %v2871_v44  ;;  %2892 = vpow2.f32 %v2050_v37  ;;  %v1540_v49 = vadd.f32 %v1539_v45, %v4132_v20  ;;  %v1541_v50 = vpop.f32.mrb[131].mxu0 }
 0x58a   :  { %v2875_v51 = vpop.eup %2874  ;;  %v1771_v52 = vadd.f32 1.0, %v2873_v46  ;;  %2894 = vpow2.f32 %v2051_v43  ;;  %v1542_v53 = vadd.f32 %v1541_v50, %v4134_v21 }
 0x58b   :  { %v2877_v54 = vpop.eup %2876  ;;  %1914 = vst [vmem:[#allocation2 + $0x80] sm:$0xff] %v2875_v51  ;;  %2896 = vrcp.f32 %v1770_v47  ;;  %v2053_v55 = vmul.f32 -1.442695, %v1540_v49 }
 0x58c   :  { %v2879_v58 = vpop.eup %2878  ;;  %1915 = vst [vmem:[#allocation2 + $0x88] sm:$0xff] %v2877_v54  ;;  %2898 = vrcp.f32 %v1771_v52  ;;  %v1545_v59 = vpop.f32.mrb[132].mxu0  ;;  %v2054_v63 = vmul.f32 -1.442695, %v1542_v53 }
 0x58d   :  { %v2881_v60 = vpop.eup %2880  ;;  %v1772_v62 = vadd.f32 1.0, %v2879_v58  ;;  %2900 = vpow2.f32 %v2052_v48  ;;  %v1546_v0 = vadd.f32 %v1545_v59, %v4132_v20  ;;  %v1547_v2 = vpop.f32.mrb[133].mxu0 }
 0x58e   :  { %v2883_v4 = vpop.eup %2882  ;;  %v1773_v5 = vadd.f32 1.0, %v2881_v60  ;;  %2902 = vpow2.f32 %v2053_v55  ;;  %v1548_v6 = vadd.f32 %v1547_v2, %v4134_v21 }
 0x58f   :  { %v2885_v7 = vpop.eup %2884  ;;  %1916 = vst [vmem:[#allocation2 + $0x90] sm:$0xff] %v2883_v4  ;;  %2904 = vrcp.f32 %v1772_v62  ;;  %v2055_v8 = vmul.f32 -1.442695, %v1546_v0 }
 0x590   :  { %v2887_v3 = vpop.eup %2886  ;;  %2906 = vrcp.f32 %v1773_v5  ;;  %v1774_v9 = vadd.f32 1.0, %v2885_v7  ;;  %v2056_v10 = vmul.f32 -1.442695, %v1548_v6  ;;  %v1551_v11 = vpop.f32.mrb[134].mxu0 }
 0x591   :  { %v2889_v12 = vpop.eup %2888  ;;  %1917 = vst [vmem:[#allocation2 + $0x98] sm:$0xff] %v2887_v3  ;;  %2908 = vpow2.f32 %v2054_v63  ;;  %v1552_v13 = vadd.f32 %v1551_v11, %v4132_v20  ;;  %v1553_v14 = vpop.f32.mrb[135].mxu0 }
 0x592   :  { %v2891_v15 = vpop.eup %2890  ;;  %1918 = vst [vmem:[#allocation2 + $0xa0] sm:$0xff] %v2889_v12  ;;  %2910 = vrcp.f32 %v1774_v9  ;;  %v1554_v16 = vadd.f32 %v1553_v14, %v4134_v21 }
 0x593   :  { %v2893_v17 = vpop.eup %2892  ;;  %1919 = vst [vmem:[#allocation2 + $0xa8] sm:$0xff] %v2891_v15  ;;  %2912 = vpow2.f32 %v2055_v8  ;;  %v2057_v61 = vmul.f32 -1.442695, %v1552_v13 }
 0x594   :  { %v2895_v18 = vpop.eup %2894  ;;  %v1775_v19 = vadd.f32 1.0, %v2893_v17  ;;  %2914 = vpow2.f32 %v2056_v10  ;;  %v2058_v22 = vmul.f32 -1.442695, %v1554_v16  ;;  %v1557_v39 = vpop.f32.mrb[136].mxu0 }
 0x595   :  { %v2897_v23 = vpop.eup %2896  ;;  %v1776_v57 = vadd.f32 1.0, %v2895_v18  ;;  %2916 = vpow2.f32 %v2057_v61  ;;  %v1558_v24 = vadd.f32 %v1557_v39, %v4132_v20  ;;  %v1559_v25 = vpop.f32.mrb[137].mxu0 }
 0x596   :  { %v2899_v26 = vpop.eup %2898  ;;  %1920 = vst [vmem:[#allocation2 + $0xb0] sm:$0xff] %v2897_v23  ;;  %2918 = vrcp.f32 %v1775_v19  ;;  %v1560_v27 = vadd.f32 %v1559_v25, %v4134_v21 }
 0x597   :  { %v2901_v28 = vpop.eup %2900  ;;  %1921 = vst [vmem:[#allocation2 + $0xb8] sm:$0xff] %v2899_v26  ;;  %2920 = vrcp.f32 %v1776_v57  ;;  %v2059_v29 = vmul.f32 -1.442695, %v1558_v24 }
 0x598   :  { %v2903_v30 = vpop.eup %2902  ;;  %v1777_v31 = vadd.f32 1.0, %v2901_v28  ;;  %2922 = vpow2.f32 %v2058_v22  ;;  %v2060_v32 = vmul.f32 -1.442695, %v1560_v27  ;;  %v1563_v33 = vpop.f32.mrb[138].mxu0 }
 0x599   :  { %v2905_v34 = vpop.eup %2904  ;;  %v1778_v35 = vadd.f32 1.0, %v2903_v30  ;;  %2924 = vpow2.f32 %v2059_v29  ;;  %v1564_v36 = vadd.f32 %v1563_v33, %v4132_v20  ;;  %v1565_v37 = vpop.f32.mrb[139].mxu0 }
 0x59a   :  { %v2907_v38 = vpop.eup %2906  ;;  %1922 = vst [vmem:[#allocation2 + $0xc0] sm:$0xff] %v2905_v34  ;;  %2926 = vrcp.f32 %v1777_v31  ;;  %v1566_v40 = vadd.f32 %v1565_v37, %v4134_v21 }
 0x59b   :  { %v2909_v41 = vpop.eup %2908  ;;  %1923 = vst [vmem:[#allocation2 + $0xc8] sm:$0xff] %v2907_v38  ;;  %2928 = vrcp.f32 %v1778_v35  ;;  %v2061_v42 = vmul.f32 -1.442695, %v1564_v36 }
 0x59c   :  { %v2911_v1 = vpop.eup %2910  ;;  %v1779_v56 = vadd.f32 1.0, %v2909_v41  ;;  %2930 = vpow2.f32 %v2060_v32  ;;  %v2062_v43 = vmul.f32 -1.442695, %v1566_v40  ;;  %v1569_v44 = vpop.f32.mrb[140].mxu0 }
 0x59d   :  { %v2913_v45 = vpop.eup %2912  ;;  %1924 = vst [vmem:[#allocation2 + $0xd0] sm:$0xff] %v2911_v1  ;;  %2932 = vpow2.f32 %v2061_v42  ;;  %v1570_v46 = vadd.f32 %v1569_v44, %v4132_v20  ;;  %v1571_v47 = vpop.f32.mrb[141].mxu0 }
 0x59e   :  { %v2915_v48 = vpop.eup %2914  ;;  %2934 = vrcp.f32 %v1779_v56  ;;  %v1780_v49 = vadd.f32 1.0, %v2913_v45  ;;  %v1572_v50 = vadd.f32 %v1571_v47, %v4134_v21 }
 0x59f   :  { %v2917_v51 = vpop.eup %2916  ;;  %v1781_v52 = vadd.f32 1.0, %v2915_v48  ;;  %2936 = vpow2.f32 %v2062_v43  ;;  %v2063_v53 = vmul.f32 -1.442695, %v1570_v46 }
 0x5a0   :  { %v2919_v54 = vpop.eup %2918  ;;  %2938 = vrcp.f32 %v1780_v49  ;;  %v1782_v55 = vadd.f32 1.0, %v2917_v51  ;;  %v2064_v58 = vmul.f32 -1.442695, %v1572_v50  ;;  %v1575_v59 = vpop.f32.mrb[150].mxu1 }
 0x5a1   :  { %v2921_v60 = vpop.eup %2920  ;;  %1925 = vst [vmem:[#allocation2 + $0xd8] sm:$0xff] %v2919_v54  ;;  %2940 = vrcp.f32 %v1781_v52  ;;  %v1576_v62 = vadd.f32 %v1575_v59, %v4132_v20  ;;  %v1577_v63 = vpop.f32.mrb[151].mxu1 }
 0x5a2   :  { %v2923_v0 = vpop.eup %2922  ;;  %1926 = vst [vmem:[#allocation2 + $0xe0] sm:$0xff] %v2921_v60  ;;  %2942 = vrcp.f32 %v1782_v55  ;;  %v1578_v2 = vadd.f32 %v1577_v63, %v4134_v21 }
 0x5a3   :  { %v2925_v4 = vpop.eup %2924  ;;  %v1783_v5 = vadd.f32 1.0, %v2923_v0  ;;  %2944 = vpow2.f32 %v2063_v53  ;;  %v2065_v6 = vmul.f32 -1.442695, %v1576_v62 }
 0x5a4   :  { %v2927_v7 = vpop.eup %2926  ;;  %v1784_v8 = vadd.f32 1.0, %v2925_v4  ;;  %2946 = vpow2.f32 %v2064_v58  ;;  %v2066_v3 = vmul.f32 -1.442695, %v1578_v2  ;;  %v1581_v9 = vpop.f32.mrb[152].mxu1 }
 0x5a5   :  { %v2929_v10 = vpop.eup %2928  ;;  %1927 = vst [vmem:[#allocation2 + $0xe8] sm:$0xff] %v2927_v7  ;;  %2948 = vrcp.f32 %v1783_v5  ;;  %v1582_v11 = vadd.f32 %v1581_v9, %v4132_v20  ;;  %v1583_v12 = vpop.f32.mrb[153].mxu1 }
 0x5a6   :  { %v2931_v13 = vpop.eup %2930  ;;  %1928 = vst [vmem:[#allocation2 + $0xf0] sm:$0xff] %v2929_v10  ;;  %2950 = vrcp.f32 %v1784_v8  ;;  %v1584_v14 = vadd.f32 %v1583_v12, %v4134_v21 }
 0x5a7   :  { %v2933_v15 = vpop.eup %2932  ;;  %v1785_v16 = vadd.f32 1.0, %v2931_v13  ;;  %2952 = vpow2.f32 %v2065_v6  ;;  %v2067_v17 = vmul.f32 -1.442695, %v1582_v11 }
 0x5a8   :  { %v2935_v61 = vpop.eup %2934  ;;  %v1786_v18 = vadd.f32 1.0, %v2933_v15  ;;  %2954 = vpow2.f32 %v2066_v3  ;;  %v1587_v19 = vpop.f32.mrb[154].mxu1  ;;  %v2068_v39 = vmul.f32 -1.442695, %v1584_v14 }
 0x5a9   :  { %v2937_v22 = vpop.eup %2936  ;;  %1929 = vst [vmem:[#allocation2 + $0xf8] sm:$0xff] %v2935_v61  ;;  %2956 = vrcp.f32 %v1785_v16  ;;  %v1588_v23 = vadd.f32 %v1587_v19, %v4132_v20  ;;  %v1589_v57 = vpop.f32.mrb[155].mxu1 }
 0x5aa   :  { %v2939_v24 = vpop.eup %2938  ;;  %2958 = vrcp.f32 %v1786_v18  ;;  %v1787_v25 = vadd.f32 1.0, %v2937_v22  ;;  %v1590_v26 = vadd.f32 %v1589_v57, %v4134_v21 }
 0x5ab   :  { %v2941_v27 = vpop.eup %2940  ;;  %1930 = vst [vmem:[#allocation2 + $0x100] sm:$0xff] %v2939_v24  ;;  %2960 = vpow2.f32 %v2067_v17  ;;  %v2069_v28 = vmul.f32 -1.442695, %v1588_v23 }
 0x5ac   :  { %v2943_v29 = vpop.eup %2942  ;;  %1931 = vst [vmem:[#allocation2 + $0x108] sm:$0xff] %v2941_v27  ;;  %2962 = vrcp.f32 %v1787_v25  ;;  %v2070_v30 = vmul.f32 -1.442695, %v1590_v26  ;;  %v1593_v31 = vpop.f32.mrb[156].mxu1 }
 0x5ad   :  { %v2945_v32 = vpop.eup %2944  ;;  %1932 = vst [vmem:[#allocation2 + $0x110] sm:$0xff] %v2943_v29  ;;  %2964 = vpow2.f32 %v2068_v39  ;;  %v1594_v33 = vadd.f32 %v1593_v31, %v4132_v20  ;;  %v1595_v34 = vpop.f32.mrb[157].mxu1 }
 0x5ae   :  { %v2947_v35 = vpop.eup %2946  ;;  %v1788_v36 = vadd.f32 1.0, %v2945_v32  ;;  %2966 = vpow2.f32 %v2069_v28  ;;  %v1596_v37 = vadd.f32 %v1595_v34, %v4134_v21 }
 0x5af   :  { %v2949_v38 = vpop.eup %2948  ;;  %v1789_v40 = vadd.f32 1.0, %v2947_v35  ;;  %2968 = vpow2.f32 %v2070_v30  ;;  %v2071_v41 = vmul.f32 -1.442695, %v1594_v33 }
 0x5b0   :  { %v2951_v42 = vpop.eup %2950  ;;  %1933 = vst [vmem:[#allocation2 + $0x118] sm:$0xff] %v2949_v38  ;;  %2970 = vrcp.f32 %v1788_v36  ;;  %v2072_v1 = vmul.f32 -1.442695, %v1596_v37 }
 0x5b1   :  { %v2953_v56 = vpop.eup %2952  ;;  %1934 = vst [vmem:[#allocation2 + $0x120] sm:$0xff] %v2951_v42  ;;  %2972 = vrcp.f32 %v1789_v40 }
 0x5b2   :  { %v2955_v43 = vpop.eup %2954  ;;  %v1790_v44 = vadd.f32 1.0, %v2953_v56  ;;  %2974 = vpow2.f32 %v2071_v41 }
 0x5b3   :  { %v2957_v20 = vpop.eup %2956  ;;  %v1791_v45 = vadd.f32 1.0, %v2955_v43  ;;  %2976 = vpow2.f32 %v2072_v1 }
 0x5b4   :  { %v2959_v46 = vpop.eup %2958  ;;  %1935 = vst [vmem:[#allocation2 + $0x128] sm:$0xff] %v2957_v20  ;;  %2978 = vrcp.f32 %v1790_v44 }
 0x5b5   :  { %v2961_v21 = vpop.eup %2960  ;;  %1936 = vst [vmem:[#allocation2 + $0x130] sm:$0xff] %v2959_v46  ;;  %2980 = vrcp.f32 %v1791_v45 }
 0x5b6   :  { %v2963_v47 = vpop.eup %2962  ;;  %v1792_v48 = vadd.f32 1.0, %v2961_v21 }
 0x5b7   :  { %v2965_v49 = vpop.eup %2964  ;;  %1937 = vst [vmem:[#allocation2 + $0x138] sm:$0xff] %v2963_v47 }
 0x5b8   :  { %v2967_v50 = vpop.eup %2966  ;;  %2982 = vrcp.f32 %v1792_v48  ;;  %v1793_v51 = vadd.f32 1.0, %v2965_v49 }
 0x5b9   :  { %v2969_v52 = vpop.eup %2968  ;;  %v1794_v53 = vadd.f32 1.0, %v2967_v50 }
 0x5ba   :  { %v2971_v54 = vpop.eup %2970  ;;  %2984 = vrcp.f32 %v1793_v51  ;;  %v1795_v55 = vadd.f32 1.0, %v2969_v52 }
 0x5bb   :  { %v2973_v58 = vpop.eup %2972  ;;  %1938 = vst [vmem:[#allocation2 + $0x140] sm:$0xff] %v2971_v54  ;;  %2986 = vrcp.f32 %v1794_v53 }
 0x5bc   :  { %v2975_v59 = vpop.eup %2974  ;;  %1939 = vst [vmem:[#allocation2 + $0x148] sm:$0xff] %v2973_v58  ;;  %2988 = vrcp.f32 %v1795_v55 }
 0x5bd   :  { %v2977_v60 = vpop.eup %2976  ;;  %v1796_v62 = vadd.f32 1.0, %v2975_v59 }
 0x5be   :  { %v2979_v63 = vpop.eup %2978  ;;  %v1797_v0 = vadd.f32 1.0, %v2977_v60 }
 0x5bf   :  { %v2981_v2 = vpop.eup %2980  ;;  %1940 = vst [vmem:[#allocation2 + $0x150] sm:$0xff] %v2979_v63  ;;  %2990 = vrcp.f32 %v1796_v62 }
 0x5c0   :  { %1941 = vst [vmem:[#allocation2 + $0x158] sm:$0xff] %v2981_v2  ;;  %2992 = vrcp.f32 %v1797_v0 }
 0x5c2   :  { %v2983_v4 = vpop.eup %2982 }
 0x5c3   :  { %1942 = vst [vmem:[#allocation2 + $0x160] sm:$0xff] %v2983_v4 }
 0x5c4   :  { %v2985_v5 = vpop.eup %2984 }
 0x5c5   :  { %v2987_v6 = vpop.eup %2986  ;;  %1943 = vst [vmem:[#allocation2 + $0x168] sm:$0xff] %v2985_v5 }
 0x5c6   :  { %v2989_v7 = vpop.eup %2988  ;;  %1944 = vst [vmem:[#allocation2 + $0x170] sm:$0xff] %v2987_v6 }
 0x5c7   :  { %1945 = vst [vmem:[#allocation2 + $0x178] sm:$0xff] %v2989_v7 }
 0x5c9   :  { %v2991_v8 = vpop.eup %2990 }
 0x5ca   :  { %v2993_v3 = vpop.eup %2992  ;;  %1946 = vst [vmem:[#allocation2 + $0x180] sm:$0xff] %v2991_v8 }
 0x5cb   :  { %1947 = vst [vmem:[#allocation2 + $0x188] sm:$0xff] %v2993_v3 }
 0x5cc   :  { %3005 = shalt.err (!%p3002_p4)
}
 0x5cd   :  { %s3006_s25 = scalar_lea.hbm %s4211_s13, 6400 }
 0x5ce   :  { %p3007_p5 = scmp.ne.s32.totalorder %s4211_s13, %s3006_s25  ;;  %p3010_p6 = scmp.lt.u32.totalorder %s3006_s25, %s4211_s13 }
 0x5d0   :  { %p3012_p7 = pnand %p3010_p6, %p3007_p5 }
 0x5d2   :  { %3015 = shalt.err (!%p3012_p7)
}
 0x5d3   :  { %s3022_s30 = smov 256   ;;  %s3023_s1 = smov 16  }
 0x5d4   :  { %1984 = dma.vmem_to_hbm [thread:$0]  %s1979_s4, 6400, %s4211_s13, [#allocation3], %s3022_s30, %s3022_s30, %s3023_s1  }
 0x5d5   :  { %3016 = dma.done.wait [#allocation3], 6400  }
 0x5d6   :  { %3017 = vsyncadd [#allocation3], 4294960896 }
 0x5d7   :  { %1992 = vsyncpa [#allocation3], 1 }

</bundles_post_ra>
